<compile_context>
chip_gen: v6e
topology: v6e:2x2x1
jax: 0.10.0
libtpu: 0.0.40
codegen_flags: <defaults>
</compile_context>

<pallas_src>
import functools

import numpy as np
import jax
import jax.numpy as jnp
from jax.experimental import pallas as pl
from jax.experimental.pallas import tpu as pltpu

TAU = 2.0          # tau_thr
V_TH = 0.5         # v_threshold of every STHLIFNode in the module
SHRINK = 0.06      # F.softshrink lambda
BN_EPS = 1e-5      # nn.BatchNorm2d default eps
W_SCALE = 0.002    # self.scale


# ----------------------------------------------------------------------------
# Small helpers.
# ----------------------------------------------------------------------------
def _lif_step(v, x_t, tau=TAU, v_th=V_TH):
    # TODO(synk): STHLIFNode is a custom spiking neuron; its forward is
    # approximated as a standard multi-step LIF (decay_input charging, hard
    # reset, Heaviside firing).  `alpha` only shapes the surrogate gradient.
    v = v + (x_t - v) * (1.0 / tau)
    s = (v >= v_th).astype(v.dtype)
    v = v * (1.0 - s)
    return v, s


def _lif_spikes(x, tau=TAU, v_th=V_TH):
    # Reference-side multi-step LIF.
    T = x.shape[0]
    v = jnp.zeros_like(x[0])
    out = []
    for t in range(T):
        v, s = _lif_step(v, x[t], tau, v_th)
        out.append(s)
    return jnp.stack(out, axis=0)


def _softshrink(x, lam=SHRINK):
    return jnp.where(x > lam, x - lam,
                     jnp.where(x < -lam, x + lam, jnp.zeros_like(x)))


def _loop_t(T, body, carry):
    # Python-unroll for small T (LLO scheduler visibility); fori_loop for
    # larger T so the live set stays bounded (perf-review feedback).
    if T <= 4:
        for t in range(T):
            carry = body(t, carry)
        return carry
    return jax.lax.fori_loop(0, T, body, carry)


# ----------------------------------------------------------------------------
# Pallas kernel: one head tile (C_t = heads_per_step * block_size channels).
# ----------------------------------------------------------------------------
def _asff_kernel(x_ref, dftr_ref, dfti_ref, p_ref, out_ref,
                 so_buf, se_buf, dr_buf, di_buf, *, T, B, blk):
    R, C_t, S = so_buf.shape                      # R = T * B

    # --- hoisted per-channel parameter vectors (broadcast over (R, C_t, S)).
    pp = p_ref[...]                               # (C_t, blk + 10) f32
    wcol = [pp[:, j:j + 1].reshape(1, C_t, 1) for j in range(blk)]
    gcol = [pp[:, blk + 2 * l:blk + 2 * l + 1].reshape(1, C_t, 1)
            for l in range(5)]
    bcol = [pp[:, blk + 2 * l + 1:blk + 2 * l + 2].reshape(1, C_t, 1)
            for l in range(5)]
    ch = jax.lax.broadcasted_iota(jnp.int32, (1, C_t, 1), 1)
    masks = [(ch % blk) < (blk - j) for j in range(1, blk)]

    dftr = dftr_ref[...]
    dfti = dfti_ref[...]

    def mix(d):
        # Block-diagonal per-head mixing (einsum 'bkihw,kio->bkohw'),
        # vectorized over the whole tile: (blk-1) sublane rolls (XLU slot) +
        # per-channel weight-vector FMAs (VPU).
        # TODO(synk): for blk >= 8 a (C_t, C_t) block-diagonal MXU matmul
        # (channels transposed into the contraction dim) would be cheaper.
        acc = d * wcol[0]
        for j in range(1, blk):
            down = pltpu.roll(d, C_t - j, axis=1)     # d[:, (c + j) % C_t, :]
            up = pltpu.roll(d, blk - j, axis=1)       # d[:, c - (blk - j), :]
            acc = acc + jnp.where(masks[j - 1], down, up) * wcol[j]
        return acc

    def bn(x, l):
        # Training-mode BatchNorm2d, two-pass biased variance, vectorized per
        # channel (stats over the (R, S) axes), affine folded in.
        inv_cnt = 1.0 / float(R * S)
        mean = jnp.sum(x, axis=(0, 2), keepdims=True) * inv_cnt
        var = jnp.sum(jnp.square(x - mean), axis=(0, 2), keepdims=True) * inv_cnt
        scale = gcol[l] * jax.lax.rsqrt(var + BN_EPS)
        return (x - mean) * scale + bcol[l]

    z0 = jnp.zeros((B, C_t, S), jnp.float32)

    # --- stages 1-3 fused per time step: input LIF (self.act) -> ortho DFT
    #     (bf16 MXU, f32 accumulation) -> real/imag spectrum LIFs (act21/22),
    #     spikes staged in f32 VMEM (exact).
    def stage123(t, carry):
        v_in, v_r, v_i = carry
        rows = pl.ds(t * B, B)
        v_in, s_in = _lif_step(v_in, x_ref[rows].astype(jnp.float32))
        s_bf = s_in.reshape(B * C_t, S).astype(jnp.bfloat16)
        y_r = jnp.dot(s_bf, dftr, preferred_element_type=jnp.float32)
        y_i = jnp.dot(s_bf, dfti, preferred_element_type=jnp.float32)
        v_r, so_t = _lif_step(v_r, y_r.reshape(B, C_t, S))
        v_i, se_t = _lif_step(v_i, y_i.reshape(B, C_t, S))
        so_buf[rows] = so_t
        se_buf[rows] = se_t
        return v_in, v_r, v_i

    _loop_t(T, stage123, (z0, z0, z0))

    # --- stage 4: first mixing + bn1_1/bn1_2 on the whole tile; the BN'd
    #     pre-activations are staged so the LIF loop (act11/act12) reads refs.
    so = so_buf[...]
    se = se_buf[...]
    dr_buf[...] = bn(mix(so - se), 0)
    di_buf[...] = bn(mix(so + se), 1)

    def stage4(t, carry):
        v1r, v1i = carry
        rows = pl.ds(t * B, B)
        v1r, s1r = _lif_step(v1r, dr_buf[rows])
        v1i, s1i = _lif_step(v1i, di_buf[rows])
        dr_buf[rows] = s1r - s1i          # inputs of the second mixing stage
        di_buf[rows] = s1i + s1r
        return v1r, v1i

    _loop_t(T, stage4, (z0, z0))

    # --- stage 5: second mixing + bn2_1/bn2_2, recombine with the spiked
    #     spectrum, softshrink (all full-tile vector ops).
    o2r = bn(mix(dr_buf[...]), 2)
    o2i = bn(mix(di_buf[...]), 3)
    z = _softshrink(so_buf[...] * (o2r - o2i) - se_buf[...] * (o2r + o2i))

    # --- stage 6: second ortho DFT (real part only) + bn3; one bulk store.
    z_bf = z.reshape(R * C_t, S).astype(jnp.bfloat16)
    z2 = jnp.dot(z_bf, dftr, preferred_element_type=jnp.float32)
    out_ref[...] = bn(z2.reshape(R, C_t, S), 4).astype(out_ref.dtype)


# ----------------------------------------------------------------------------
# Parameter setup + wrapper (plain-JAX glue).
# ----------------------------------------------------------------------------
def dft2_ortho_matrices(H, W):
    # K[u*W+v, h*W+w] = exp(-2πi(uh/H + vw/W)) / sqrt(H*W); right-mult form.
    def dft1(n):
        idx = np.arange(n)
        ang = -2.0 * np.pi * np.outer(idx, idx) / n
        return (np.cos(ang) + 1j * np.sin(ang)) / np.sqrt(n)

    kmat = np.kron(dft1(H), dft1(W))
    d = kmat.T                                  # Y_flat = X_flat @ d
    return jnp.asarray(d.real, jnp.float32), jnp.asarray(d.imag, jnp.float32)


def init_asff_params(key, dim, num_heads=8, hidden_size_factor=1):
    assert dim % num_heads == 0
    block = dim // num_heads
    w1 = W_SCALE * jax.random.normal(
        key, (1, num_heads, block, block * hidden_size_factor), jnp.float32)
    gamma = jnp.ones((5, dim), jnp.float32)     # bn1_1, bn1_2, bn2_1, bn2_2, bn3
    beta = jnp.zeros((5, dim), jnp.float32)
    return {"w1": w1, "gamma": gamma, "beta": beta}


def _vmem_capacity_bytes():
    try:
        info = pltpu.get_tpu_info()
        return int(getattr(info, "vmem_capacity_bytes", 64 << 20))
    except Exception:
        return 64 << 20                         # conservative (v7x per-TC)


def _pick_heads_per_step(num_heads, blk, bytes_per_channel, budget):
    # Largest heads-per-step that (a) keeps >=2 grid tiles so both v7x
    # TensorCores get work and BlockSpec double-buffering engages, (b) keeps
    # the channel tile 8-aligned, (c) fits the per-tile VMEM budget.
    valid = [h for h in range(1, num_heads)
             if num_heads % h == 0 and (h * blk) % 8 == 0]
    if not valid:
        return num_heads                        # tiny models: one tile, C_t == C
    for hpt in sorted(valid, reverse=True):
        if hpt * blk * bytes_per_channel <= budget:
            return hpt
    return valid[0]


def asff_forward(x, alpha, params, heads_per_step=None):
    """Pallas forward of ASFF.  x: (T, B, C, H, W)."""
    del alpha  # TODO(synk): alpha only shapes the surrogate gradient (no fwd effect).
    T, B, C, H, W = x.shape
    S = H * W
    w1 = params["w1"][0]                        # (K, I, O)
    K, I, O = w1.shape
    assert I == O and C == K * I, "hidden_size_factor != 1 not supported"
    blk = I

    vmem_cap = _vmem_capacity_bytes()
    # ~18 tile-sized f32 arrays live at peak (double-buffered x/out, 4 scratch
    # buffers, in-flight temporaries) -> per-channel working-set estimate.
    per_channel_bytes = T * B * S * 4 * 18
    hpt = heads_per_step or _pick_heads_per_step(K, blk, per_channel_bytes,
                                                 vmem_cap // 2)
    assert K % hpt == 0
    n_tiles = K // hpt
    C_t = hpt * blk

    dft_r, dft_i = dft2_ortho_matrices(H, W)
    dft_rb = dft_r.astype(jnp.bfloat16)
    dft_ib = dft_i.astype(jnp.bfloat16)

    # Packed per-channel parameters, one (C_t, blk+10) VMEM block per tile:
    #   cols [0, blk)          : mixing-weight "diagonals"
    #                            wv[c, j] = w1[c//blk, (c%blk + j) % blk, c%blk]
    #   cols blk+2l, blk+2l+1  : gamma_l, beta_l of the 5 BatchNorms.
    c_idx = jnp.arange(C)
    k_idx = c_idx // blk
    o_idx = c_idx % blk
    wv = jnp.stack([w1[k_idx, (o_idx + j) % blk, o_idx] for j in range(blk)],
                   axis=1)
    gb = jnp.concatenate(
        [jnp.stack([params["gamma"][l], params["beta"][l]], axis=1)
         for l in range(5)], axis=1)
    pp = jnp.concatenate([wv, gb], axis=1).astype(jnp.float32)   # (C, blk+10)

    x_k = x.reshape(T * B, C, S)

    tile_f32 = T * B * C_t * S * 4
    need = (2 * 2 * T * B * C_t * S * x.dtype.itemsize     # x/out, double-buffered
            + 4 * tile_f32                                  # staging scratch
            + 10 * tile_f32                                 # in-flight temporaries
            + 2 * (2 * S * S * 2 + C_t * (blk + 10) * 4)    # DFT mats + params
            + (4 << 20))
    vmem_limit = int(min(max(need, 8 << 20), (vmem_cap * 3) // 4))

    kernel = functools.partial(_asff_kernel, T=T, B=B, blk=blk)
    out = pl.pallas_call(
        kernel,
        out_shape=jax.ShapeDtypeStruct((T * B, C, S), x.dtype),
        grid=(n_tiles,),
        in_specs=[
            pl.BlockSpec((T * B, C_t, S), lambda h: (0, h, 0)),
            pl.BlockSpec((S, S), lambda h: (0, 0)),
            pl.BlockSpec((S, S), lambda h: (0, 0)),
            pl.BlockSpec((C_t, blk + 10), lambda h: (h, 0)),
        ],
        out_specs=pl.BlockSpec((T * B, C_t, S), lambda h: (0, h, 0)),
        scratch_shapes=[pltpu.VMEM((T * B, C_t, S), jnp.float32)
                        for _ in range(4)],
        compiler_params=pltpu.CompilerParams(
            dimension_semantics=("parallel",),
            vmem_limit_bytes=vmem_limit),
    )(x_k, dft_rb, dft_ib, pp)
    return out.reshape(T, B, C, H, W)


# ----------------------------------------------------------------------------
# Pure-JAX reference (same math and same bf16-operand MXU policy).
# ----------------------------------------------------------------------------
def asff_reference(x, alpha, params):
    del alpha
    T, B, C, H, W = x.shape
    S = H * W
    dft_r, dft_i = dft2_ortho_matrices(H, W)
    dft_rb = dft_r.astype(jnp.bfloat16)
    dft_ib = dft_i.astype(jnp.bfloat16)
    w1 = params["w1"][0]                        # (K, I, O) f32
    K, I, O = w1.shape
    gamma = params["gamma"]
    beta = params["beta"]

    def bn(v, l):  # batch stats over (T*B, H, W) per channel, two-pass
        mean = jnp.mean(v, axis=(0, 1, 3, 4), keepdims=True)
        var = jnp.mean(jnp.square(v - mean), axis=(0, 1, 3, 4), keepdims=True)
        g = gamma[l][None, None, :, None, None]
        bb = beta[l][None, None, :, None, None]
        return (v - mean) * jax.lax.rsqrt(var + BN_EPS) * g + bb

    def fft2_parts(v):  # bf16 operands, f32 accumulation (matches kernel MXU)
        vf = v.reshape(T, B, C, S).astype(jnp.bfloat16)
        yr = jnp.einsum('tbcs,sf->tbcf', vf, dft_rb,
                        preferred_element_type=jnp.float32)
        yi = jnp.einsum('tbcs,sf->tbcf', vf, dft_ib,
                        preferred_element_type=jnp.float32)
        return yr.reshape(T, B, C, H, W), yi.reshape(T, B, C, H, W)

    def mix(v):  # einsum('bkihw,kio->bkohw') with T, B kept separate, f32 math
        vb = v.reshape(T, B, K, I, H, W)
        return jnp.einsum('tbkihw,kio->tbkohw', vb, w1,
                          precision=jax.lax.Precision.HIGHEST,
                          preferred_element_type=jnp.float32,
                          ).reshape(T, B, C, H, W)

    xs = _lif_spikes(x.astype(jnp.float32))
    yr, yi = fft2_parts(xs)
    so = _lif_spikes(yr)
    se = _lif_spikes(yi)
    o1r = _lif_spikes(bn(mix(so - se), 0))
    o1i = _lif_spikes(bn(mix(so + se), 1))
    o2r = bn(mix(o1r - o1i), 2)
    o2i = bn(mix(o1i + o1r), 3)
    z = _softshrink(so * (o2r - o2i) - se * (o2r + o2i))
    zr, _ = fft2_parts(z)
    return bn(zr, 4).astype(x.dtype)


if __name__ == "__main__":
    T, B, C, H, W = 2, 2, 16, 8, 8              # dim=16, num_heads=8 -> block=2
    key = jax.random.PRNGKey(0)
    kx, kw, kg, kb = jax.random.split(key, 4)
    x = jax.random.normal(kx, (T, B, C, H, W), dtype=jnp.float32)
    alpha = 2.0
    params = init_asff_params(kw, dim=C, num_heads=8)
    # Exercise the BN affine path (torch default init is weight=1 / bias=0).
    params["gamma"] = 1.0 + 0.1 * jax.random.normal(kg, (5, C), jnp.float32)
    params["beta"] = 0.1 * jax.random.normal(kb, (5, C), jnp.float32)

    out = jax.block_until_ready(asff_forward(x, alpha, params))
    assert out.shape == (T, B, C, H, W)
    assert bool(jnp.all(jnp.isfinite(out)))

    # Sanity 1: the Kronecker DFT matrices reproduce fft2(norm='ortho').
    dft_r, dft_i = dft2_ortho_matrices(H, W)
    probe = jax.random.normal(jax.random.PRNGKey(1), (3, H, W), jnp.float32)
    want = jnp.fft.fft2(probe, norm='ortho')
    got = jnp.matmul(probe.reshape(3, H * W), dft_r + 1j * dft_i,
                     precision=jax.lax.Precision.HIGHEST).reshape(3, H, W)
    assert float(jnp.max(jnp.abs(got - want))) < 1e-4

    # Sanity 2: kernel matches the pure-JAX reference (same numeric policy).
    ref = asff_reference(x, alpha, params)
    err = float(jnp.max(jnp.abs(out - ref)))
    assert err < 1e-2, f"kernel/reference mismatch: {err}"

    print("KERNEL_OK")
</pallas_src>

<mosaic_0001>
module attributes {stable_mosaic.version = 11 : i64} {
  func.func @_asff_kernel(%arg0: i32, %arg1: memref<4x8x64xf32, #tpu.memory_space<vmem>>, %arg2: memref<64x64xbf16, #tpu.memory_space<vmem>>, %arg3: memref<64x64xbf16, #tpu.memory_space<vmem>>, %arg4: memref<8x12xf32, #tpu.memory_space<vmem>>, %arg5: memref<4x8x64xf32, #tpu.memory_space<vmem>>, %arg6: memref<4x8x64xf32, #tpu.memory_space<vmem>>, %arg7: memref<4x8x64xf32, #tpu.memory_space<vmem>>, %arg8: memref<4x8x64xf32, #tpu.memory_space<vmem>>, %arg9: memref<4x8x64xf32, #tpu.memory_space<vmem>>) attributes {dimension_semantics = [#tpu.dimension_semantics<parallel>], iteration_bounds = array<i64: 2>, scalar_prefetch = 0 : i64, scratch_operands = 4 : i64, tpu.core_type = #tpu.core_type<tc>, window_params = [{transform_indices = @transform_0, window_bounds = array<i64: 4, 8, 64>}, {pipeline_mode = #tpu.pipeline_mode<synchronous>, transform_indices = @transform_1, window_bounds = array<i64: 64, 64>}, {pipeline_mode = #tpu.pipeline_mode<synchronous>, transform_indices = @transform_2, window_bounds = array<i64: 64, 64>}, {transform_indices = @transform_3, window_bounds = array<i64: 8, 12>}, {transform_indices = @transform_4, window_bounds = array<i64: 4, 8, 64>}]} {
    %c0 = arith.constant 0 : index
    %c0_0 = arith.constant 0 : index
    %0 = vector.load %arg4[%c0, %c0_0] : memref<8x12xf32, #tpu.memory_space<vmem>>, vector<8x12xf32>
    %1 = vector.extract_strided_slice %0 {offsets = [0, 0], sizes = [8, 1], strides = [1, 1]} : vector<8x12xf32> to vector<8x1xf32>
    %2 = vector.shape_cast %1 : vector<8x1xf32> to vector<1x8x1xf32>
    %3 = vector.extract_strided_slice %0 {offsets = [0, 1], sizes = [8, 1], strides = [1, 1]} : vector<8x12xf32> to vector<8x1xf32>
    %4 = vector.shape_cast %3 : vector<8x1xf32> to vector<1x8x1xf32>
    %5 = vector.extract_strided_slice %0 {offsets = [0, 2], sizes = [8, 1], strides = [1, 1]} : vector<8x12xf32> to vector<8x1xf32>
    %6 = vector.shape_cast %5 : vector<8x1xf32> to vector<1x8x1xf32>
    %7 = vector.extract_strided_slice %0 {offsets = [0, 4], sizes = [8, 1], strides = [1, 1]} : vector<8x12xf32> to vector<8x1xf32>
    %8 = vector.shape_cast %7 : vector<8x1xf32> to vector<1x8x1xf32>
    %9 = vector.extract_strided_slice %0 {offsets = [0, 6], sizes = [8, 1], strides = [1, 1]} : vector<8x12xf32> to vector<8x1xf32>
    %10 = vector.shape_cast %9 : vector<8x1xf32> to vector<1x8x1xf32>
    %11 = vector.extract_strided_slice %0 {offsets = [0, 8], sizes = [8, 1], strides = [1, 1]} : vector<8x12xf32> to vector<8x1xf32>
    %12 = vector.shape_cast %11 : vector<8x1xf32> to vector<1x8x1xf32>
    %13 = vector.extract_strided_slice %0 {offsets = [0, 10], sizes = [8, 1], strides = [1, 1]} : vector<8x12xf32> to vector<8x1xf32>
    %14 = vector.shape_cast %13 : vector<8x1xf32> to vector<1x8x1xf32>
    %15 = vector.extract_strided_slice %0 {offsets = [0, 3], sizes = [8, 1], strides = [1, 1]} : vector<8x12xf32> to vector<8x1xf32>
    %16 = vector.shape_cast %15 : vector<8x1xf32> to vector<1x8x1xf32>
    %17 = vector.extract_strided_slice %0 {offsets = [0, 5], sizes = [8, 1], strides = [1, 1]} : vector<8x12xf32> to vector<8x1xf32>
    %18 = vector.shape_cast %17 : vector<8x1xf32> to vector<1x8x1xf32>
    %19 = vector.extract_strided_slice %0 {offsets = [0, 7], sizes = [8, 1], strides = [1, 1]} : vector<8x12xf32> to vector<8x1xf32>
    %20 = vector.shape_cast %19 : vector<8x1xf32> to vector<1x8x1xf32>
    %21 = vector.extract_strided_slice %0 {offsets = [0, 9], sizes = [8, 1], strides = [1, 1]} : vector<8x12xf32> to vector<8x1xf32>
    %22 = vector.shape_cast %21 : vector<8x1xf32> to vector<1x8x1xf32>
    %23 = vector.extract_strided_slice %0 {offsets = [0, 11], sizes = [8, 1], strides = [1, 1]} : vector<8x12xf32> to vector<8x1xf32>
    %24 = vector.shape_cast %23 : vector<8x1xf32> to vector<1x8x1xf32>
    %25 = tpu.iota {dimensions = array<i32: 1>} : vector<1x8x1xi32>
    %c2_i32 = arith.constant 2 : i32
    %c0_i32 = arith.constant 0 : i32
    %26 = arith.cmpi eq, %c2_i32, %c0_i32 : i32
    %c1_i32 = arith.constant 1 : i32
    %27 = arith.select %26, %c1_i32, %c2_i32 : i32
    %28 = vector.broadcast %27 : i32 to vector<1x8x1xi32>
    %29 = arith.remsi %25, %28 : vector<1x8x1xi32>
    %c0_i32_1 = arith.constant 0 : i32
    %30 = vector.broadcast %c0_i32_1 : i32 to vector<1x8x1xi32>
    %31 = arith.cmpi ne, %29, %30 : vector<1x8x1xi32>
    %c0_i32_2 = arith.constant 0 : i32
    %32 = vector.broadcast %c0_i32_2 : i32 to vector<1x8x1xi32>
    %33 = arith.cmpi slt, %29, %32 : vector<1x8x1xi32>
    %c0_i32_3 = arith.constant 0 : i32
    %34 = arith.cmpi slt, %27, %c0_i32_3 : i32
    %35 = vector.broadcast %34 : i1 to vector<1x8x1xi1>
    %36 = vector.broadcast %35 : vector<1x8x1xi1> to vector<1x8x1xi1>
    %37 = arith.xori %33, %36 : vector<1x8x1xi1>
    %38 = arith.andi %37, %31 : vector<1x8x1xi1>
    %39 = vector.broadcast %27 : i32 to vector<1x8x1xi32>
    %40 = arith.addi %29, %39 : vector<1x8x1xi32>
    %41 = arith.select %38, %40, %29 : vector<1x8x1xi1>, vector<1x8x1xi32>
    %c1_i32_4 = arith.constant 1 : i32
    %42 = vector.broadcast %c1_i32_4 : i32 to vector<1x8x1xi32>
    %43 = arith.cmpi slt, %41, %42 : vector<1x8x1xi32>
    %c0_5 = arith.constant 0 : index
    %c0_6 = arith.constant 0 : index
    %44 = vector.load %arg2[%c0_5, %c0_6] : memref<64x64xbf16, #tpu.memory_space<vmem>>, vector<64x64xbf16>
    %c0_7 = arith.constant 0 : index
    %c0_8 = arith.constant 0 : index
    %45 = vector.load %arg3[%c0_7, %c0_8] : memref<64x64xbf16, #tpu.memory_space<vmem>>, vector<64x64xbf16>
    %cst = arith.constant 0.000000e+00 : f32
    %46 = vector.broadcast %cst : f32 to vector<2x8x64xf32>
    %c0_9 = arith.constant 0 : index
    %c0_10 = arith.constant 0 : index
    %c0_11 = arith.constant 0 : index
    %47 = vector.load %arg1[%c0_9, %c0_10, %c0_11] : memref<4x8x64xf32, #tpu.memory_space<vmem>>, vector<2x8x64xf32>
    %48 = arith.subf %47, %46 : vector<2x8x64xf32>
    %cst_12 = arith.constant 5.000000e-01 : f32
    %49 = vector.broadcast %cst_12 : f32 to vector<2x8x64xf32>
    %50 = arith.mulf %48, %49 : vector<2x8x64xf32>
    %51 = arith.addf %46, %50 : vector<2x8x64xf32>
    %cst_13 = arith.constant 5.000000e-01 : f32
    %52 = vector.broadcast %cst_13 : f32 to vector<2x8x64xf32>
    %53 = arith.cmpf oge, %51, %52 : vector<2x8x64xf32>
    %54 = arith.extui %53 : vector<2x8x64xi1> to vector<2x8x64xi32>
    %55 = arith.sitofp %54 : vector<2x8x64xi32> to vector<2x8x64xf32>
    %cst_14 = arith.constant 1.000000e+00 : f32
    %56 = vector.broadcast %cst_14 : f32 to vector<2x8x64xf32>
    %57 = arith.subf %56, %55 : vector<2x8x64xf32>
    %58 = arith.mulf %51, %57 : vector<2x8x64xf32>
    %59 = vector.shape_cast %55 : vector<2x8x64xf32> to vector<16x64xf32>
    %60 = arith.truncf %59 : vector<16x64xf32> to vector<16x64xbf16>
    %cst_15 = arith.constant dense<0.000000e+00> : vector<16x64xf32>
    %61 = tpu.matmul %60, %44, %cst_15 {dimension_numbers = #tpu.dot_dimension_numbers<[1], [0], [0], [1], [0, 0, 1, 1], [], []>} : vector<16x64xbf16>, vector<64x64xbf16>, vector<16x64xf32> -> vector<16x64xf32>
    %cst_16 = arith.constant dense<0.000000e+00> : vector<16x64xf32>
    %62 = tpu.matmul %60, %45, %cst_16 {dimension_numbers = #tpu.dot_dimension_numbers<[1], [0], [0], [1], [0, 0, 1, 1], [], []>} : vector<16x64xbf16>, vector<64x64xbf16>, vector<16x64xf32> -> vector<16x64xf32>
    %63 = vector.shape_cast %61 : vector<16x64xf32> to vector<2x8x64xf32>
    %64 = arith.subf %63, %46 : vector<2x8x64xf32>
    %cst_17 = arith.constant 5.000000e-01 : f32
    %65 = vector.broadcast %cst_17 : f32 to vector<2x8x64xf32>
    %66 = arith.mulf %64, %65 : vector<2x8x64xf32>
    %67 = arith.addf %46, %66 : vector<2x8x64xf32>
    %cst_18 = arith.constant 5.000000e-01 : f32
    %68 = vector.broadcast %cst_18 : f32 to vector<2x8x64xf32>
    %69 = arith.cmpf oge, %67, %68 : vector<2x8x64xf32>
    %70 = arith.extui %69 : vector<2x8x64xi1> to vector<2x8x64xi32>
    %71 = arith.sitofp %70 : vector<2x8x64xi32> to vector<2x8x64xf32>
    %cst_19 = arith.constant 1.000000e+00 : f32
    %72 = vector.broadcast %cst_19 : f32 to vector<2x8x64xf32>
    %73 = arith.subf %72, %71 : vector<2x8x64xf32>
    %74 = arith.mulf %67, %73 : vector<2x8x64xf32>
    %75 = vector.shape_cast %62 : vector<16x64xf32> to vector<2x8x64xf32>
    %76 = arith.subf %75, %46 : vector<2x8x64xf32>
    %cst_20 = arith.constant 5.000000e-01 : f32
    %77 = vector.broadcast %cst_20 : f32 to vector<2x8x64xf32>
    %78 = arith.mulf %76, %77 : vector<2x8x64xf32>
    %79 = arith.addf %46, %78 : vector<2x8x64xf32>
    %cst_21 = arith.constant 5.000000e-01 : f32
    %80 = vector.broadcast %cst_21 : f32 to vector<2x8x64xf32>
    %81 = arith.cmpf oge, %79, %80 : vector<2x8x64xf32>
    %82 = arith.extui %81 : vector<2x8x64xi1> to vector<2x8x64xi32>
    %83 = arith.sitofp %82 : vector<2x8x64xi32> to vector<2x8x64xf32>
    %cst_22 = arith.constant 1.000000e+00 : f32
    %84 = vector.broadcast %cst_22 : f32 to vector<2x8x64xf32>
    %85 = arith.subf %84, %83 : vector<2x8x64xf32>
    %86 = arith.mulf %79, %85 : vector<2x8x64xf32>
    %c0_23 = arith.constant 0 : index
    %c0_24 = arith.constant 0 : index
    %c0_25 = arith.constant 0 : index
    %87 = vector.load %arg6[%c0_23, %c0_24, %c0_25] : memref<4x8x64xf32, #tpu.memory_space<vmem>>, vector<2x8x64xf32>
    tpu.vector_store %arg6[%c0_23, %c0_24, %c0_25], %71 {strides = array<i32>} : memref<4x8x64xf32, #tpu.memory_space<vmem>>, vector<2x8x64xf32>,
    %c0_26 = arith.constant 0 : index
    %c0_27 = arith.constant 0 : index
    %c0_28 = arith.constant 0 : index
    %88 = vector.load %arg7[%c0_26, %c0_27, %c0_28] : memref<4x8x64xf32, #tpu.memory_space<vmem>>, vector<2x8x64xf32>
    tpu.vector_store %arg7[%c0_26, %c0_27, %c0_28], %83 {strides = array<i32>} : memref<4x8x64xf32, #tpu.memory_space<vmem>>, vector<2x8x64xf32>,
    %c2 = arith.constant 2 : index
    %c0_29 = arith.constant 0 : index
    %c0_30 = arith.constant 0 : index
    %89 = vector.load %arg1[%c2, %c0_29, %c0_30] : memref<4x8x64xf32, #tpu.memory_space<vmem>>, vector<2x8x64xf32>
    %90 = arith.subf %89, %58 : vector<2x8x64xf32>
    %cst_31 = arith.constant 5.000000e-01 : f32
    %91 = vector.broadcast %cst_31 : f32 to vector<2x8x64xf32>
    %92 = arith.mulf %90, %91 : vector<2x8x64xf32>
    %93 = arith.addf %58, %92 : vector<2x8x64xf32>
    %cst_32 = arith.constant 5.000000e-01 : f32
    %94 = vector.broadcast %cst_32 : f32 to vector<2x8x64xf32>
    %95 = arith.cmpf oge, %93, %94 : vector<2x8x64xf32>
    %96 = arith.extui %95 : vector<2x8x64xi1> to vector<2x8x64xi32>
    %97 = arith.sitofp %96 : vector<2x8x64xi32> to vector<2x8x64xf32>
    %98 = vector.shape_cast %97 : vector<2x8x64xf32> to vector<16x64xf32>
    %99 = arith.truncf %98 : vector<16x64xf32> to vector<16x64xbf16>
    %cst_33 = arith.constant dense<0.000000e+00> : vector<16x64xf32>
    %100 = tpu.matmul %99, %44, %cst_33 {dimension_numbers = #tpu.dot_dimension_numbers<[1], [0], [0], [1], [0, 0, 1, 1], [], []>} : vector<16x64xbf16>, vector<64x64xbf16>, vector<16x64xf32> -> vector<16x64xf32>
    %cst_34 = arith.constant dense<0.000000e+00> : vector<16x64xf32>
    %101 = tpu.matmul %99, %45, %cst_34 {dimension_numbers = #tpu.dot_dimension_numbers<[1], [0], [0], [1], [0, 0, 1, 1], [], []>} : vector<16x64xbf16>, vector<64x64xbf16>, vector<16x64xf32> -> vector<16x64xf32>
    %102 = vector.shape_cast %100 : vector<16x64xf32> to vector<2x8x64xf32>
    %103 = arith.subf %102, %74 : vector<2x8x64xf32>
    %cst_35 = arith.constant 5.000000e-01 : f32
    %104 = vector.broadcast %cst_35 : f32 to vector<2x8x64xf32>
    %105 = arith.mulf %103, %104 : vector<2x8x64xf32>
    %106 = arith.addf %74, %105 : vector<2x8x64xf32>
    %cst_36 = arith.constant 5.000000e-01 : f32
    %107 = vector.broadcast %cst_36 : f32 to vector<2x8x64xf32>
    %108 = arith.cmpf oge, %106, %107 : vector<2x8x64xf32>
    %109 = arith.extui %108 : vector<2x8x64xi1> to vector<2x8x64xi32>
    %110 = arith.sitofp %109 : vector<2x8x64xi32> to vector<2x8x64xf32>
    %111 = vector.shape_cast %101 : vector<16x64xf32> to vector<2x8x64xf32>
    %112 = arith.subf %111, %86 : vector<2x8x64xf32>
    %cst_37 = arith.constant 5.000000e-01 : f32
    %113 = vector.broadcast %cst_37 : f32 to vector<2x8x64xf32>
    %114 = arith.mulf %112, %113 : vector<2x8x64xf32>
    %115 = arith.addf %86, %114 : vector<2x8x64xf32>
    %cst_38 = arith.constant 5.000000e-01 : f32
    %116 = vector.broadcast %cst_38 : f32 to vector<2x8x64xf32>
    %117 = arith.cmpf oge, %115, %116 : vector<2x8x64xf32>
    %118 = arith.extui %117 : vector<2x8x64xi1> to vector<2x8x64xi32>
    %119 = arith.sitofp %118 : vector<2x8x64xi32> to vector<2x8x64xf32>
    %c2_39 = arith.constant 2 : index
    %c0_40 = arith.constant 0 : index
    %c0_41 = arith.constant 0 : index
    %120 = vector.load %arg6[%c2_39, %c0_40, %c0_41] : memref<4x8x64xf32, #tpu.memory_space<vmem>>, vector<2x8x64xf32>
    tpu.vector_store %arg6[%c2_39, %c0_40, %c0_41], %110 {strides = array<i32>} : memref<4x8x64xf32, #tpu.memory_space<vmem>>, vector<2x8x64xf32>,
    %c2_42 = arith.constant 2 : index
    %c0_43 = arith.constant 0 : index
    %c0_44 = arith.constant 0 : index
    %121 = vector.load %arg7[%c2_42, %c0_43, %c0_44] : memref<4x8x64xf32, #tpu.memory_space<vmem>>, vector<2x8x64xf32>
    tpu.vector_store %arg7[%c2_42, %c0_43, %c0_44], %119 {strides = array<i32>} : memref<4x8x64xf32, #tpu.memory_space<vmem>>, vector<2x8x64xf32>,
    %c0_45 = arith.constant 0 : index
    %c0_46 = arith.constant 0 : index
    %c0_47 = arith.constant 0 : index
    %122 = vector.load %arg6[%c0_45, %c0_46, %c0_47] : memref<4x8x64xf32, #tpu.memory_space<vmem>>, vector<4x8x64xf32>
    %c0_48 = arith.constant 0 : index
    %c0_49 = arith.constant 0 : index
    %c0_50 = arith.constant 0 : index
    %123 = vector.load %arg7[%c0_48, %c0_49, %c0_50] : memref<4x8x64xf32, #tpu.memory_space<vmem>>, vector<4x8x64xf32>
    %124 = arith.subf %122, %123 : vector<4x8x64xf32>
    %125 = vector.broadcast %2 : vector<1x8x1xf32> to vector<4x8x64xf32>
    %126 = arith.mulf %124, %125 : vector<4x8x64xf32>
    %c7_i32 = arith.constant 7 : i32
    %127 = tpu.dynamic_rotate %124 by %c7_i32 dim 1 : vector<4x8x64xf32>, i32 -> vector<4x8x64xf32>
    %c1_i32_51 = arith.constant 1 : i32
    %128 = tpu.dynamic_rotate %124 by %c1_i32_51 dim 1 : vector<4x8x64xf32>, i32 -> vector<4x8x64xf32>
    %129 = vector.shape_cast %43 : vector<1x8x1xi1> to vector<1x8x1xi1>
    %130 = vector.broadcast %129 : vector<1x8x1xi1> to vector<4x8x64xi1>
    %131 = arith.select %130, %127, %128 : vector<4x8x64xi1>, vector<4x8x64xf32>
    %132 = vector.broadcast %4 : vector<1x8x1xf32> to vector<4x8x64xf32>
    %133 = arith.mulf %131, %132 : vector<4x8x64xf32>
    %134 = arith.addf %126, %133 : vector<4x8x64xf32>
    %cst_52 = arith.constant dense<0.000000e+00> : vector<8xf32>
    %135 = vector.multi_reduction <add>, %134, %cst_52 [0, 2] : vector<4x8x64xf32> to vector<8xf32>
    %136 = vector.shape_cast %135 : vector<8xf32> to vector<1x8x1xf32>
    %cst_53 = arith.constant 3.906250e-03 : f32
    %137 = vector.broadcast %cst_53 : f32 to vector<1x8x1xf32>
    %138 = arith.mulf %136, %137 : vector<1x8x1xf32>
    %139 = vector.broadcast %138 : vector<1x8x1xf32> to vector<4x8x64xf32>
    %140 = arith.subf %134, %139 : vector<4x8x64xf32>
    %141 = arith.mulf %140, %140 : vector<4x8x64xf32>
    %cst_54 = arith.constant dense<0.000000e+00> : vector<8xf32>
    %142 = vector.multi_reduction <add>, %141, %cst_54 [0, 2] : vector<4x8x64xf32> to vector<8xf32>
    %143 = vector.shape_cast %142 : vector<8xf32> to vector<1x8x1xf32>
    %cst_55 = arith.constant 3.906250e-03 : f32
    %144 = vector.broadcast %cst_55 : f32 to vector<1x8x1xf32>
    %145 = arith.mulf %143, %144 : vector<1x8x1xf32>
    %cst_56 = arith.constant 9.99999974E-6 : f32
    %146 = vector.broadcast %cst_56 : f32 to vector<1x8x1xf32>
    %147 = arith.addf %145, %146 : vector<1x8x1xf32>
    %148 = math.rsqrt %147 : vector<1x8x1xf32>
    %149 = arith.mulf %6, %148 : vector<1x8x1xf32>
    %150 = vector.broadcast %138 : vector<1x8x1xf32> to vector<4x8x64xf32>
    %151 = arith.subf %134, %150 : vector<4x8x64xf32>
    %152 = vector.broadcast %149 : vector<1x8x1xf32> to vector<4x8x64xf32>
    %153 = arith.mulf %151, %152 : vector<4x8x64xf32>
    %154 = vector.broadcast %16 : vector<1x8x1xf32> to vector<4x8x64xf32>
    %155 = arith.addf %153, %154 : vector<4x8x64xf32>
    %c0_57 = arith.constant 0 : index
    %c0_58 = arith.constant 0 : index
    %c0_59 = arith.constant 0 : index
    %156 = vector.load %arg8[%c0_57, %c0_58, %c0_59] : memref<4x8x64xf32, #tpu.memory_space<vmem>>, vector<4x8x64xf32>
    tpu.vector_store %arg8[%c0_57, %c0_58, %c0_59], %155 {strides = array<i32>} : memref<4x8x64xf32, #tpu.memory_space<vmem>>, vector<4x8x64xf32>,
    %157 = arith.addf %122, %123 : vector<4x8x64xf32>
    %158 = vector.broadcast %2 : vector<1x8x1xf32> to vector<4x8x64xf32>
    %159 = arith.mulf %157, %158 : vector<4x8x64xf32>
    %c7_i32_60 = arith.constant 7 : i32
    %160 = tpu.dynamic_rotate %157 by %c7_i32_60 dim 1 : vector<4x8x64xf32>, i32 -> vector<4x8x64xf32>
    %c1_i32_61 = arith.constant 1 : i32
    %161 = tpu.dynamic_rotate %157 by %c1_i32_61 dim 1 : vector<4x8x64xf32>, i32 -> vector<4x8x64xf32>
    %162 = vector.shape_cast %43 : vector<1x8x1xi1> to vector<1x8x1xi1>
    %163 = vector.broadcast %162 : vector<1x8x1xi1> to vector<4x8x64xi1>
    %164 = arith.select %163, %160, %161 : vector<4x8x64xi1>, vector<4x8x64xf32>
    %165 = vector.broadcast %4 : vector<1x8x1xf32> to vector<4x8x64xf32>
    %166 = arith.mulf %164, %165 : vector<4x8x64xf32>
    %167 = arith.addf %159, %166 : vector<4x8x64xf32>
    %cst_62 = arith.constant dense<0.000000e+00> : vector<8xf32>
    %168 = vector.multi_reduction <add>, %167, %cst_62 [0, 2] : vector<4x8x64xf32> to vector<8xf32>
    %169 = vector.shape_cast %168 : vector<8xf32> to vector<1x8x1xf32>
    %cst_63 = arith.constant 3.906250e-03 : f32
    %170 = vector.broadcast %cst_63 : f32 to vector<1x8x1xf32>
    %171 = arith.mulf %169, %170 : vector<1x8x1xf32>
    %172 = vector.broadcast %171 : vector<1x8x1xf32> to vector<4x8x64xf32>
    %173 = arith.subf %167, %172 : vector<4x8x64xf32>
    %174 = arith.mulf %173, %173 : vector<4x8x64xf32>
    %cst_64 = arith.constant dense<0.000000e+00> : vector<8xf32>
    %175 = vector.multi_reduction <add>, %174, %cst_64 [0, 2] : vector<4x8x64xf32> to vector<8xf32>
    %176 = vector.shape_cast %175 : vector<8xf32> to vector<1x8x1xf32>
    %cst_65 = arith.constant 3.906250e-03 : f32
    %177 = vector.broadcast %cst_65 : f32 to vector<1x8x1xf32>
    %178 = arith.mulf %176, %177 : vector<1x8x1xf32>
    %cst_66 = arith.constant 9.99999974E-6 : f32
    %179 = vector.broadcast %cst_66 : f32 to vector<1x8x1xf32>
    %180 = arith.addf %178, %179 : vector<1x8x1xf32>
    %181 = math.rsqrt %180 : vector<1x8x1xf32>
    %182 = arith.mulf %8, %181 : vector<1x8x1xf32>
    %183 = vector.broadcast %171 : vector<1x8x1xf32> to vector<4x8x64xf32>
    %184 = arith.subf %167, %183 : vector<4x8x64xf32>
    %185 = vector.broadcast %182 : vector<1x8x1xf32> to vector<4x8x64xf32>
    %186 = arith.mulf %184, %185 : vector<4x8x64xf32>
    %187 = vector.broadcast %18 : vector<1x8x1xf32> to vector<4x8x64xf32>
    %188 = arith.addf %186, %187 : vector<4x8x64xf32>
    %c0_67 = arith.constant 0 : index
    %c0_68 = arith.constant 0 : index
    %c0_69 = arith.constant 0 : index
    %189 = vector.load %arg9[%c0_67, %c0_68, %c0_69] : memref<4x8x64xf32, #tpu.memory_space<vmem>>, vector<4x8x64xf32>
    tpu.vector_store %arg9[%c0_67, %c0_68, %c0_69], %188 {strides = array<i32>} : memref<4x8x64xf32, #tpu.memory_space<vmem>>, vector<4x8x64xf32>,
    %c0_70 = arith.constant 0 : index
    %c0_71 = arith.constant 0 : index
    %c0_72 = arith.constant 0 : index
    %190 = vector.load %arg8[%c0_70, %c0_71, %c0_72] : memref<4x8x64xf32, #tpu.memory_space<vmem>>, vector<2x8x64xf32>
    %191 = arith.subf %190, %46 : vector<2x8x64xf32>
    %cst_73 = arith.constant 5.000000e-01 : f32
    %192 = vector.broadcast %cst_73 : f32 to vector<2x8x64xf32>
    %193 = arith.mulf %191, %192 : vector<2x8x64xf32>
    %194 = arith.addf %46, %193 : vector<2x8x64xf32>
    %cst_74 = arith.constant 5.000000e-01 : f32
    %195 = vector.broadcast %cst_74 : f32 to vector<2x8x64xf32>
    %196 = arith.cmpf oge, %194, %195 : vector<2x8x64xf32>
    %197 = arith.extui %196 : vector<2x8x64xi1> to vector<2x8x64xi32>
    %198 = arith.sitofp %197 : vector<2x8x64xi32> to vector<2x8x64xf32>
    %cst_75 = arith.constant 1.000000e+00 : f32
    %199 = vector.broadcast %cst_75 : f32 to vector<2x8x64xf32>
    %200 = arith.subf %199, %198 : vector<2x8x64xf32>
    %201 = arith.mulf %194, %200 : vector<2x8x64xf32>
    %c0_76 = arith.constant 0 : index
    %c0_77 = arith.constant 0 : index
    %c0_78 = arith.constant 0 : index
    %202 = vector.load %arg9[%c0_76, %c0_77, %c0_78] : memref<4x8x64xf32, #tpu.memory_space<vmem>>, vector<2x8x64xf32>
    %203 = arith.subf %202, %46 : vector<2x8x64xf32>
    %cst_79 = arith.constant 5.000000e-01 : f32
    %204 = vector.broadcast %cst_79 : f32 to vector<2x8x64xf32>
    %205 = arith.mulf %203, %204 : vector<2x8x64xf32>
    %206 = arith.addf %46, %205 : vector<2x8x64xf32>
    %cst_80 = arith.constant 5.000000e-01 : f32
    %207 = vector.broadcast %cst_80 : f32 to vector<2x8x64xf32>
    %208 = arith.cmpf oge, %206, %207 : vector<2x8x64xf32>
    %209 = arith.extui %208 : vector<2x8x64xi1> to vector<2x8x64xi32>
    %210 = arith.sitofp %209 : vector<2x8x64xi32> to vector<2x8x64xf32>
    %cst_81 = arith.constant 1.000000e+00 : f32
    %211 = vector.broadcast %cst_81 : f32 to vector<2x8x64xf32>
    %212 = arith.subf %211, %210 : vector<2x8x64xf32>
    %213 = arith.mulf %206, %212 : vector<2x8x64xf32>
    %214 = arith.subf %198, %210 : vector<2x8x64xf32>
    %c0_82 = arith.constant 0 : index
    %c0_83 = arith.constant 0 : index
    %c0_84 = arith.constant 0 : index
    %215 = vector.load %arg8[%c0_82, %c0_83, %c0_84] : memref<4x8x64xf32, #tpu.memory_space<vmem>>, vector<2x8x64xf32>
    tpu.vector_store %arg8[%c0_82, %c0_83, %c0_84], %214 {strides = array<i32>} : memref<4x8x64xf32, #tpu.memory_space<vmem>>, vector<2x8x64xf32>,
    %216 = arith.addf %210, %198 : vector<2x8x64xf32>
    %c0_85 = arith.constant 0 : index
    %c0_86 = arith.constant 0 : index
    %c0_87 = arith.constant 0 : index
    %217 = vector.load %arg9[%c0_85, %c0_86, %c0_87] : memref<4x8x64xf32, #tpu.memory_space<vmem>>, vector<2x8x64xf32>
    tpu.vector_store %arg9[%c0_85, %c0_86, %c0_87], %216 {strides = array<i32>} : memref<4x8x64xf32, #tpu.memory_space<vmem>>, vector<2x8x64xf32>,
    %c2_88 = arith.constant 2 : index
    %c0_89 = arith.constant 0 : index
    %c0_90 = arith.constant 0 : index
    %218 = vector.load %arg8[%c2_88, %c0_89, %c0_90] : memref<4x8x64xf32, #tpu.memory_space<vmem>>, vector<2x8x64xf32>
    %219 = arith.subf %218, %201 : vector<2x8x64xf32>
    %cst_91 = arith.constant 5.000000e-01 : f32
    %220 = vector.broadcast %cst_91 : f32 to vector<2x8x64xf32>
    %221 = arith.mulf %219, %220 : vector<2x8x64xf32>
    %222 = arith.addf %201, %221 : vector<2x8x64xf32>
    %cst_92 = arith.constant 5.000000e-01 : f32
    %223 = vector.broadcast %cst_92 : f32 to vector<2x8x64xf32>
    %224 = arith.cmpf oge, %222, %223 : vector<2x8x64xf32>
    %225 = arith.extui %224 : vector<2x8x64xi1> to vector<2x8x64xi32>
    %226 = arith.sitofp %225 : vector<2x8x64xi32> to vector<2x8x64xf32>
    %c2_93 = arith.constant 2 : index
    %c0_94 = arith.constant 0 : index
    %c0_95 = arith.constant 0 : index
    %227 = vector.load %arg9[%c2_93, %c0_94, %c0_95] : memref<4x8x64xf32, #tpu.memory_space<vmem>>, vector<2x8x64xf32>
    %228 = arith.subf %227, %213 : vector<2x8x64xf32>
    %cst_96 = arith.constant 5.000000e-01 : f32
    %229 = vector.broadcast %cst_96 : f32 to vector<2x8x64xf32>
    %230 = arith.mulf %228, %229 : vector<2x8x64xf32>
    %231 = arith.addf %213, %230 : vector<2x8x64xf32>
    %cst_97 = arith.constant 5.000000e-01 : f32
    %232 = vector.broadcast %cst_97 : f32 to vector<2x8x64xf32>
    %233 = arith.cmpf oge, %231, %232 : vector<2x8x64xf32>
    %234 = arith.extui %233 : vector<2x8x64xi1> to vector<2x8x64xi32>
    %235 = arith.sitofp %234 : vector<2x8x64xi32> to vector<2x8x64xf32>
    %236 = arith.subf %226, %235 : vector<2x8x64xf32>
    %c2_98 = arith.constant 2 : index
    %c0_99 = arith.constant 0 : index
    %c0_100 = arith.constant 0 : index
    %237 = vector.load %arg8[%c2_98, %c0_99, %c0_100] : memref<4x8x64xf32, #tpu.memory_space<vmem>>, vector<2x8x64xf32>
    tpu.vector_store %arg8[%c2_98, %c0_99, %c0_100], %236 {strides = array<i32>} : memref<4x8x64xf32, #tpu.memory_space<vmem>>, vector<2x8x64xf32>,
    %238 = arith.addf %235, %226 : vector<2x8x64xf32>
    %c2_101 = arith.constant 2 : index
    %c0_102 = arith.constant 0 : index
    %c0_103 = arith.constant 0 : index
    %239 = vector.load %arg9[%c2_101, %c0_102, %c0_103] : memref<4x8x64xf32, #tpu.memory_space<vmem>>, vector<2x8x64xf32>
    tpu.vector_store %arg9[%c2_101, %c0_102, %c0_103], %238 {strides = array<i32>} : memref<4x8x64xf32, #tpu.memory_space<vmem>>, vector<2x8x64xf32>,
    %c0_104 = arith.constant 0 : index
    %c0_105 = arith.constant 0 : index
    %c0_106 = arith.constant 0 : index
    %240 = vector.load %arg8[%c0_104, %c0_105, %c0_106] : memref<4x8x64xf32, #tpu.memory_space<vmem>>, vector<4x8x64xf32>
    %241 = vector.broadcast %2 : vector<1x8x1xf32> to vector<4x8x64xf32>
    %242 = arith.mulf %240, %241 : vector<4x8x64xf32>
    %c7_i32_107 = arith.constant 7 : i32
    %243 = tpu.dynamic_rotate %240 by %c7_i32_107 dim 1 : vector<4x8x64xf32>, i32 -> vector<4x8x64xf32>
    %c1_i32_108 = arith.constant 1 : i32
    %244 = tpu.dynamic_rotate %240 by %c1_i32_108 dim 1 : vector<4x8x64xf32>, i32 -> vector<4x8x64xf32>
    %245 = vector.shape_cast %43 : vector<1x8x1xi1> to vector<1x8x1xi1>
    %246 = vector.broadcast %245 : vector<1x8x1xi1> to vector<4x8x64xi1>
    %247 = arith.select %246, %243, %244 : vector<4x8x64xi1>, vector<4x8x64xf32>
    %248 = vector.broadcast %4 : vector<1x8x1xf32> to vector<4x8x64xf32>
    %249 = arith.mulf %247, %248 : vector<4x8x64xf32>
    %250 = arith.addf %242, %249 : vector<4x8x64xf32>
    %cst_109 = arith.constant dense<0.000000e+00> : vector<8xf32>
    %251 = vector.multi_reduction <add>, %250, %cst_109 [0, 2] : vector<4x8x64xf32> to vector<8xf32>
    %252 = vector.shape_cast %251 : vector<8xf32> to vector<1x8x1xf32>
    %cst_110 = arith.constant 3.906250e-03 : f32
    %253 = vector.broadcast %cst_110 : f32 to vector<1x8x1xf32>
    %254 = arith.mulf %252, %253 : vector<1x8x1xf32>
    %255 = vector.broadcast %254 : vector<1x8x1xf32> to vector<4x8x64xf32>
    %256 = arith.subf %250, %255 : vector<4x8x64xf32>
    %257 = arith.mulf %256, %256 : vector<4x8x64xf32>
    %cst_111 = arith.constant dense<0.000000e+00> : vector<8xf32>
    %258 = vector.multi_reduction <add>, %257, %cst_111 [0, 2] : vector<4x8x64xf32> to vector<8xf32>
    %259 = vector.shape_cast %258 : vector<8xf32> to vector<1x8x1xf32>
    %cst_112 = arith.constant 3.906250e-03 : f32
    %260 = vector.broadcast %cst_112 : f32 to vector<1x8x1xf32>
    %261 = arith.mulf %259, %260 : vector<1x8x1xf32>
    %cst_113 = arith.constant 9.99999974E-6 : f32
    %262 = vector.broadcast %cst_113 : f32 to vector<1x8x1xf32>
    %263 = arith.addf %261, %262 : vector<1x8x1xf32>
    %264 = math.rsqrt %263 : vector<1x8x1xf32>
    %265 = arith.mulf %10, %264 : vector<1x8x1xf32>
    %266 = vector.broadcast %254 : vector<1x8x1xf32> to vector<4x8x64xf32>
    %267 = arith.subf %250, %266 : vector<4x8x64xf32>
    %268 = vector.broadcast %265 : vector<1x8x1xf32> to vector<4x8x64xf32>
    %269 = arith.mulf %267, %268 : vector<4x8x64xf32>
    %270 = vector.broadcast %20 : vector<1x8x1xf32> to vector<4x8x64xf32>
    %271 = arith.addf %269, %270 : vector<4x8x64xf32>
    %c0_114 = arith.constant 0 : index
    %c0_115 = arith.constant 0 : index
    %c0_116 = arith.constant 0 : index
    %272 = vector.load %arg9[%c0_114, %c0_115, %c0_116] : memref<4x8x64xf32, #tpu.memory_space<vmem>>, vector<4x8x64xf32>
    %273 = vector.broadcast %2 : vector<1x8x1xf32> to vector<4x8x64xf32>
    %274 = arith.mulf %272, %273 : vector<4x8x64xf32>
    %c7_i32_117 = arith.constant 7 : i32
    %275 = tpu.dynamic_rotate %272 by %c7_i32_117 dim 1 : vector<4x8x64xf32>, i32 -> vector<4x8x64xf32>
    %c1_i32_118 = arith.constant 1 : i32
    %276 = tpu.dynamic_rotate %272 by %c1_i32_118 dim 1 : vector<4x8x64xf32>, i32 -> vector<4x8x64xf32>
    %277 = vector.shape_cast %43 : vector<1x8x1xi1> to vector<1x8x1xi1>
    %278 = vector.broadcast %277 : vector<1x8x1xi1> to vector<4x8x64xi1>
    %279 = arith.select %278, %275, %276 : vector<4x8x64xi1>, vector<4x8x64xf32>
    %280 = vector.broadcast %4 : vector<1x8x1xf32> to vector<4x8x64xf32>
    %281 = arith.mulf %279, %280 : vector<4x8x64xf32>
    %282 = arith.addf %274, %281 : vector<4x8x64xf32>
    %cst_119 = arith.constant dense<0.000000e+00> : vector<8xf32>
    %283 = vector.multi_reduction <add>, %282, %cst_119 [0, 2] : vector<4x8x64xf32> to vector<8xf32>
    %284 = vector.shape_cast %283 : vector<8xf32> to vector<1x8x1xf32>
    %cst_120 = arith.constant 3.906250e-03 : f32
    %285 = vector.broadcast %cst_120 : f32 to vector<1x8x1xf32>
    %286 = arith.mulf %284, %285 : vector<1x8x1xf32>
    %287 = vector.broadcast %286 : vector<1x8x1xf32> to vector<4x8x64xf32>
    %288 = arith.subf %282, %287 : vector<4x8x64xf32>
    %289 = arith.mulf %288, %288 : vector<4x8x64xf32>
    %cst_121 = arith.constant dense<0.000000e+00> : vector<8xf32>
    %290 = vector.multi_reduction <add>, %289, %cst_121 [0, 2] : vector<4x8x64xf32> to vector<8xf32>
    %291 = vector.shape_cast %290 : vector<8xf32> to vector<1x8x1xf32>
    %cst_122 = arith.constant 3.906250e-03 : f32
    %292 = vector.broadcast %cst_122 : f32 to vector<1x8x1xf32>
    %293 = arith.mulf %291, %292 : vector<1x8x1xf32>
    %cst_123 = arith.constant 9.99999974E-6 : f32
    %294 = vector.broadcast %cst_123 : f32 to vector<1x8x1xf32>
    %295 = arith.addf %293, %294 : vector<1x8x1xf32>
    %296 = math.rsqrt %295 : vector<1x8x1xf32>
    %297 = arith.mulf %12, %296 : vector<1x8x1xf32>
    %298 = vector.broadcast %286 : vector<1x8x1xf32> to vector<4x8x64xf32>
    %299 = arith.subf %282, %298 : vector<4x8x64xf32>
    %300 = vector.broadcast %297 : vector<1x8x1xf32> to vector<4x8x64xf32>
    %301 = arith.mulf %299, %300 : vector<4x8x64xf32>
    %302 = vector.broadcast %22 : vector<1x8x1xf32> to vector<4x8x64xf32>
    %303 = arith.addf %301, %302 : vector<4x8x64xf32>
    %c0_124 = arith.constant 0 : index
    %c0_125 = arith.constant 0 : index
    %c0_126 = arith.constant 0 : index
    %304 = vector.load %arg6[%c0_124, %c0_125, %c0_126] : memref<4x8x64xf32, #tpu.memory_space<vmem>>, vector<4x8x64xf32>
    %305 = arith.subf %271, %303 : vector<4x8x64xf32>
    %306 = arith.mulf %304, %305 : vector<4x8x64xf32>
    %c0_127 = arith.constant 0 : index
    %c0_128 = arith.constant 0 : index
    %c0_129 = arith.constant 0 : index
    %307 = vector.load %arg7[%c0_127, %c0_128, %c0_129] : memref<4x8x64xf32, #tpu.memory_space<vmem>>, vector<4x8x64xf32>
    %308 = arith.addf %271, %303 : vector<4x8x64xf32>
    %309 = arith.mulf %307, %308 : vector<4x8x64xf32>
    %310 = arith.subf %306, %309 : vector<4x8x64xf32>
    %cst_130 = arith.constant 6.000000e-02 : f32
    %311 = vector.broadcast %cst_130 : f32 to vector<4x8x64xf32>
    %312 = arith.cmpf ogt, %310, %311 : vector<4x8x64xf32>
    %cst_131 = arith.constant 6.000000e-02 : f32
    %313 = vector.broadcast %cst_131 : f32 to vector<4x8x64xf32>
    %314 = arith.subf %310, %313 : vector<4x8x64xf32>
    %cst_132 = arith.constant -6.000000e-02 : f32
    %315 = vector.broadcast %cst_132 : f32 to vector<4x8x64xf32>
    %316 = arith.cmpf olt, %310, %315 : vector<4x8x64xf32>
    %cst_133 = arith.constant 6.000000e-02 : f32
    %317 = vector.broadcast %cst_133 : f32 to vector<4x8x64xf32>
    %318 = arith.addf %310, %317 : vector<4x8x64xf32>
    %cst_134 = arith.constant 0.000000e+00 : f32
    %319 = vector.broadcast %cst_134 : f32 to vector<4x8x64xf32>
    %320 = arith.select %316, %318, %319 : vector<4x8x64xi1>, vector<4x8x64xf32>
    %321 = arith.select %312, %314, %320 : vector<4x8x64xi1>, vector<4x8x64xf32>
    %322 = vector.shape_cast %321 : vector<4x8x64xf32> to vector<32x64xf32>
    %323 = arith.truncf %322 : vector<32x64xf32> to vector<32x64xbf16>
    %cst_135 = arith.constant dense<0.000000e+00> : vector<32x64xf32>
    %324 = tpu.matmul %323, %44, %cst_135 {dimension_numbers = #tpu.dot_dimension_numbers<[1], [0], [0], [1], [0, 0, 1, 1], [], []>} : vector<32x64xbf16>, vector<64x64xbf16>, vector<32x64xf32> -> vector<32x64xf32>
    %325 = vector.shape_cast %324 : vector<32x64xf32> to vector<4x8x64xf32>
    %cst_136 = arith.constant dense<0.000000e+00> : vector<8xf32>
    %326 = vector.multi_reduction <add>, %325, %cst_136 [0, 2] : vector<4x8x64xf32> to vector<8xf32>
    %327 = vector.shape_cast %326 : vector<8xf32> to vector<1x8x1xf32>
    %cst_137 = arith.constant 3.906250e-03 : f32
    %328 = vector.broadcast %cst_137 : f32 to vector<1x8x1xf32>
    %329 = arith.mulf %327, %328 : vector<1x8x1xf32>
    %330 = vector.broadcast %329 : vector<1x8x1xf32> to vector<4x8x64xf32>
    %331 = arith.subf %325, %330 : vector<4x8x64xf32>
    %332 = arith.mulf %331, %331 : vector<4x8x64xf32>
    %cst_138 = arith.constant dense<0.000000e+00> : vector<8xf32>
    %333 = vector.multi_reduction <add>, %332, %cst_138 [0, 2] : vector<4x8x64xf32> to vector<8xf32>
    %334 = vector.shape_cast %333 : vector<8xf32> to vector<1x8x1xf32>
    %cst_139 = arith.constant 3.906250e-03 : f32
    %335 = vector.broadcast %cst_139 : f32 to vector<1x8x1xf32>
    %336 = arith.mulf %334, %335 : vector<1x8x1xf32>
    %cst_140 = arith.constant 9.99999974E-6 : f32
    %337 = vector.broadcast %cst_140 : f32 to vector<1x8x1xf32>
    %338 = arith.addf %336, %337 : vector<1x8x1xf32>
    %339 = math.rsqrt %338 : vector<1x8x1xf32>
    %340 = arith.mulf %14, %339 : vector<1x8x1xf32>
    %341 = vector.broadcast %329 : vector<1x8x1xf32> to vector<4x8x64xf32>
    %342 = arith.subf %325, %341 : vector<4x8x64xf32>
    %343 = vector.broadcast %340 : vector<1x8x1xf32> to vector<4x8x64xf32>
    %344 = arith.mulf %342, %343 : vector<4x8x64xf32>
    %345 = vector.broadcast %24 : vector<1x8x1xf32> to vector<4x8x64xf32>
    %346 = arith.addf %344, %345 : vector<4x8x64xf32>
    %c0_141 = arith.constant 0 : index
    %c0_142 = arith.constant 0 : index
    %c0_143 = arith.constant 0 : index
    %347 = vector.load %arg5[%c0_141, %c0_142, %c0_143] : memref<4x8x64xf32, #tpu.memory_space<vmem>>, vector<4x8x64xf32>
    tpu.vector_store %arg5[%c0_141, %c0_142, %c0_143], %346 {strides = array<i32>} : memref<4x8x64xf32, #tpu.memory_space<vmem>>, vector<4x8x64xf32>,
    return
  }
  func.func @transform_0(%arg0: i32) -> (i32, i32, i32) {
    %c0_i32 = arith.constant 0 : i32
    %c0_i32_0 = arith.constant 0 : i32
    %c0_i32_1 = arith.constant 0 : i32
    return %c0_i32, %arg0, %c0_i32_0 : i32, i32, i32
  }
  func.func @transform_1(%arg0: i32) -> (i32, i32) {
    %c0_i32 = arith.constant 0 : i32
    %c0_i32_0 = arith.constant 0 : i32
    %c0_i32_1 = arith.constant 0 : i32
    return %c0_i32, %c0_i32_0 : i32, i32
  }
  func.func @transform_2(%arg0: i32) -> (i32, i32) {
    %c0_i32 = arith.constant 0 : i32
    %c0_i32_0 = arith.constant 0 : i32
    %c0_i32_1 = arith.constant 0 : i32
    return %c0_i32, %c0_i32_0 : i32, i32
  }
  func.func @transform_3(%arg0: i32) -> (i32, i32) {
    %c0_i32 = arith.constant 0 : i32
    %c0_i32_0 = arith.constant 0 : i32
    return %arg0, %c0_i32 : i32, i32
  }
  func.func @transform_4(%arg0: i32) -> (i32, i32, i32) {
    %c0_i32 = arith.constant 0 : i32
    %c0_i32_0 = arith.constant 0 : i32
    %c0_i32_1 = arith.constant 0 : i32
    return %c0_i32, %arg0, %c0_i32_0 : i32, i32, i32
  }
}

</mosaic_0001>

<bundles_post_ra>
// kernel: tpu_custom_call.1
= control target key start
LH: loop header
LB: loop body
LE: loop exit
PB: predicated region body
PF: predicated region fallthrough
CT: control target
= control target key end

     0   :  { %s2368_s0 = inlined_call_operand.hbm [shape: f32[4,16,64], index: 0, kind: input, shape index: {}]   ;;  %s2369_s1 = inlined_call_operand.hbm [shape: bf16[64,64], index: 1, kind: input, shape index: {}]   ;;  %s2370_s2 = inlined_call_operand.hbm [shape: bf16[64,64], index: 2, kind: input, shape index: {}]   ;;  %s2371_s3 = inlined_call_operand.hbm [shape: f32[16,12], index: 3, kind: input, shape index: {}]   ;;  %s2372_s4 = inlined_call_operand.hbm [shape: f32[4,16,64], index: 4, kind: output, shape index: {}]  }
   0x1   :  { %2377 = sst [smem:[#allocation19_spill]] %s2368_s0 }
   0x2   :  { %2378 = sst [smem:[#allocation20_spill]] %s2369_s1 }
   0x3   :  { %9 = vsyncpa [#allocation7], 0 }
   0x4   :  { %11 = vsyncpa [#allocation7 + $0x1], 0 }
   0x5   :  { %12 = vsyncpa [#allocation10], 0 }
   0x6   :  { %13 = vsyncpa [#allocation13], 0 }
   0x7   :  { %15 = vsyncpa [#allocation13 + $0x1], 0 }
   0x8   :  { %16 = vsyncpa [#allocation8], 0 }
   0x9   :  { %18 = vsyncpa [#allocation8 + $0x1], 0  ;;  %s1831_s15 = smov 0   ;;  %s1833_s16 = smov 0  }
   0xa   :  { %s1835_s17 = smov 0   ;;  %s1837_s18 = smov 0  }
   0xb LB: > { %s1852_s19 = sadd.s32 4294967295, %s1777_s18   ;;  %s1326_s20 = sadd.s32 4294967294, %s1777_s18   ;;  %s1777_s18 = sphi %s1837_s18, %s2400_s18   ;;  %s1773_s17 = sphi %s1835_s17, %s2399_s17   ;;  %s1769_s16 = sphi %s1833_s16, %s2398_s16   ;;  %s1765_s15 = sphi %s1831_s15, %s2397_s15  }
   0xc   : > { %s1856_s21 = sadd.s32 1, %s1777_s18   ;;  %s31_s22 = sadd.s32 1, %s1773_s17 }
   0xd   : > { %s28_s23 = ssub.s32 %s1777_s18, %s1856_s21  ;;  %p38_p0 = scmp.ne.s32.totalorder %s1773_s17, %s1769_s16 }
   0xe   : > { %p29_p1 = scmp.eq.s32.totalorder %s28_s23, 0  ;;  %p39_p2 = scmp.eq.s32.totalorder %s1777_s18, 0 }
   0xf   : > { %p44_p3 = scmp.ne.s32.totalorder %s1769_s16, %s1765_s15  ;;  %p2374_p4 = scmp.eq.s32.totalorder %s1852_s19, 0 }
  0x10   : > { %s1868_s24 = scalar_select %p29_p1, %s1773_s17, %s31_s22  }
  0x11   : > { %p1870_p5 = por %p39_p2, %p38_p0  ;;  %p1876_p6 = por %p2374_p4, %p44_p3 }
  0x12   : > { %p136_p7 = scmp.eq.s32.totalorder %s1852_s19, 1  ;;  %p142_p8 = scmp.eq.s32.totalorder %s1326_s20, 1 }
  0x13   : > { %s2380_s26 = scalar_select %p1876_p6, 1, 0 }
  0x14   : > { %p1327_p9 = scmp.ge.s32.totalorder %s1777_s18, 1  ;;  %p149_p10 = scmp.lt.s32.totalorder %s1777_s18, 3 }
  0x15   : > { %p1883_p11 = por %p136_p7, %p38_p0  ;;  %p1887_p12 = por %p142_p8, %p44_p3 }
  0x16   : > { %p1891_p13 = pnand %p1327_p9, %p149_p10  ;;  %s1779_s30 = smov [#allocation9]  }
  0x17   : > { %s2381_s27 = scalar_select %p1883_p11, 1, 0 }
  0x18   : > { %s2382_s28 = scalar_select %p1887_p12, 1, 0 }
  0x19   : > { %s2383_s29 = scalar_select %p1891_p13, 1, 0 }
  0x1a   : > { %p1485_p1 = pneg %p1891_p13  ;;  %s161_s5 = sshll.u32 %s1779_s30, 4  ;;  %s162_s5 = int_to_ptr.vmem [resolvable:$true] %s161_s5 }
  0x1b   : > { %p1505_p3 = scmp.lt.s32.totalorder %s1777_s18, 2  ;;  %s1780_s7 = smov [#allocation11]  }
  0x1c   : > { %p1899_p2 = pnand %p1485_p1, %p2374_p4  ;;  %s174_s8 = sshll.u32 %s1780_s7, 4  ;;  %s175_s8 = int_to_ptr.vmem [resolvable:$true] %s174_s8 }
  0x1d   : > { %s1608_s9 = scalar_lea.vmem %s162_s5, 512  ;;  %p1616_p12 = scmp.lt.s32.totalorder %s162_s5, %s162_s5 }
  0x1e   : > { %p1599_p7 = pneg %p1899_p2  ;;  %p1609_p8 = scmp.ne.s32.totalorder %s162_s5, %s1608_s9 }
  0x1f   : > { %p1617_p11 = scmp.lt.s32.totalorder %s1608_s9, %s1608_s9 }
  0x20   : > { %p1611_p9 = pnand %p1609_p8, %p1599_p7 }
  0x21   : > { %p1618_p1 = por %p1617_p11, %p1616_p12 }
  0x22   : > { %p1612_p10 = pneg %p1611_p9 }
  0x24   : > { %p1619_p4 = pnand %p1618_p1, %p1612_p10 }
  0x26   : > { %1622 = shalt.err (!%p1619_p4)
}
  0x27   : > { %s1781_s10 = smov 64   ;;  %s1782_s11 = smov 4  }
  0x28   : > { %s2385_s1 = sld [smem:[#allocation20_spill]]  ;;  %p1919_p8 = pnand %p1505_p3, %p1870_p5 }
  0x29   : > { %s1634_s20 = scalar_lea.vmem %s175_s8, 512  ;;  %p1642_p9 = scmp.lt.s32.totalorder %s175_s8, %s175_s8 }
  0x2a   : > { %p1635_p4 = scmp.ne.s32.totalorder %s175_s8, %s1634_s20  ;;  %p1643_p10 = scmp.lt.s32.totalorder %s1634_s20, %s1634_s20 }
  0x2c   : > { %p1637_p11 = pnand %p1635_p4, %p1599_p7  ;;  %p1644_p1 = por %p1643_p10, %p1642_p9 }
  0x2e   : > { %1488 = dma.hbm_to_vmem [thread:$0]  (!%p1899_p2), %s2385_s1, 512, %s162_s5, [#allocation10], %s1781_s10, %s1781_s10, %s1782_s11  }
  0x2f   : > { %p1638_p12 = pneg %p1637_p11 }
  0x31   : > { %p1645_p0 = pnand %p1644_p1, %p1638_p12 }
  0x33   : > { %1648 = shalt.err (!%p1645_p0)
}
  0x34   : > { %1491 = dma.hbm_to_vmem [thread:$0]  (!%p1899_p2), %s2370_s2, 512, %s175_s8, [#allocation10], %s1781_s10, %s1781_s10, %s1782_s11  }
  0x35   : > { %s1932_s25 = sand.u32 1, %s1773_s17   ;;  %s1332_s5 = sshll.u32 %s1777_s18, 7 }
  0x36   : > { %s1331_s30 = sshll.u32 %s1932_s25, 5  ;;  %s2387_s0 = sld [smem:[#allocation19_spill]] }
  0x37   : > { %s192_s12 = scalar_lea.vmem [#allocation6], %s1331_s30  ;;  %s189_s8 = scalar_lea.sflag [#allocation7], %s1932_s25 }
  0x38   : > { %s198_s13 = sshll.u32 %s192_s12, 4  ;;  %p1651_p2 = pneg %p1919_p8  ;;  %s1943_s13 = int_to_ptr.vmem [resolvable:$true] %s198_s13 }
  0x3c   : > { %s1941_s6 = scalar_lea.hbm %s2387_s0, %s1332_s5  ;;  %s1654_s22 = scalar_lea.hbm %s2387_s0, 1024 }
  0x3d   : > { %s1649_s10 = scalar_lea.hbm %s1941_s6, 512  ;;  %p1655_p7 = scmp.lt.s32.totalorder %s1941_s6, %s2387_s0 }
  0x3e   : > { %p1650_p5 = scmp.ne.s32.totalorder %s1941_s6, %s1649_s10  ;;  %p1656_p4 = scmp.lt.s32.totalorder %s1654_s22, %s1649_s10 }
  0x40   : > { %p1652_p0 = pnand %p1651_p2, %p1650_p5  ;;  %p1657_p11 = por %p1656_p4, %p1655_p7 }
  0x42   : > { %p1653_p3 = pneg %p1652_p0 }
  0x44   : > { %p1658_p12 = pnand %p1657_p11, %p1653_p3 }
  0x46   : > { %1661 = shalt.err (!%p1658_p12)
}
  0x47   : > { %s1662_s30 = scalar_lea.vmem %s1943_s13, 512  ;;  %s1783_s9 = smov [#allocation6]  }
  0x48   : > { %p1663_p9 = scmp.ne.s32.totalorder %s1943_s13, %s1662_s30  ;;  %s1667_s12 = sshll.u32 %s1783_s9, 4  ;;  %s1668_s12 = int_to_ptr.vmem [resolvable:$false] %s1667_s12 }
  0x49   : > { %s1669_s11 = scalar_lea.vmem %s1668_s12, 1024  ;;  %p1670_p5 = scmp.lt.s32.totalorder %s1943_s13, %s1668_s12 }
  0x4a   : > { %p1665_p10 = pnand %p1663_p9, %p1651_p2  ;;  %p1671_p0 = scmp.lt.s32.totalorder %s1669_s11, %s1662_s30 }
  0x4c   : > { %p1666_p1 = pneg %p1665_p10  ;;  %p1672_p6 = por %p1671_p0, %p1670_p5 }
  0x4e   : > { %p1673_p7 = pnand %p1672_p6, %p1666_p1 }
  0x50   : > { %1676 = shalt.err (!%p1673_p7)
}
  0x51   : > { %s1784_s10 = smov 256   ;;  %s1785_s20 = smov 128  }
  0x52   : > { %s1786_s22 = smov 8   ;;  %s1333_s23 = sshll.u32 %s1932_s25, 3 }
  0x53   : > { %1495 = dma.hbm_to_vmem [thread:$0]  (!%p1919_p8), %s1941_s6, 512, %s1943_s13, %s189_s8, %s1784_s10, %s1785_s20, %s1786_s22  }
  0x54   : > { %s1978_s9 = scalar_lea.hbm %s2371_s3, %s1332_s5  ;;  %s212_s12 = scalar_lea.vmem [#allocation12], %s1333_s23 }
  0x55   : > { %s219_s11 = sshll.u32 %s212_s12, 4  ;;  %s209_s0 = scalar_lea.sflag [#allocation13], %s1932_s25  ;;  %s220_s11 = int_to_ptr.vmem [resolvable:$true] %s219_s11 }
  0x56   : > { %s1677_s1 = scalar_lea.hbm %s1978_s9, 128  ;;  %s1682_s8 = scalar_lea.hbm %s2371_s3, 256 }
  0x57   : > { %p1678_p6 = scmp.ne.s32.totalorder %s1978_s9, %s1677_s1  ;;  %p1683_p11 = scmp.lt.s32.totalorder %s1978_s9, %s2371_s3 }
  0x58   : > { %p1684_p12 = scmp.lt.s32.totalorder %s1682_s8, %s1677_s1 }
  0x59   : > { %p1680_p3 = pnand %p1678_p6, %p1651_p2 }
  0x5a   : > { %p1685_p9 = por %p1684_p12, %p1683_p11 }
  0x5b   : > { %p1681_p4 = pneg %p1680_p3 }
  0x5d   : > { %p1686_p10 = pnand %p1685_p9, %p1681_p4 }
  0x5f   : > { %1689 = shalt.err (!%p1686_p10)
}
  0x60   : > { %s1690_s20 = scalar_lea.vmem %s220_s11, 128  ;;  %s1787_s25 = smov [#allocation12]  }
  0x61   : > { %p1691_p1 = scmp.ne.s32.totalorder %s220_s11, %s1690_s20  ;;  %s1695_s22 = sshll.u32 %s1787_s25, 4  ;;  %s1696_s22 = int_to_ptr.vmem [resolvable:$false] %s1695_s22 }
  0x62   : > { %s1697_s23 = scalar_lea.vmem %s1696_s22, 256  ;;  %p1698_p7 = scmp.lt.s32.totalorder %s220_s11, %s1696_s22 }
  0x63   : > { %p1693_p5 = pnand %p1691_p1, %p1651_p2  ;;  %p1699_p6 = scmp.lt.s32.totalorder %s1697_s23, %s1690_s20 }
  0x65   : > { %p1694_p0 = pneg %p1693_p5  ;;  %p1700_p3 = por %p1699_p6, %p1698_p7 }
  0x67   : > { %p1701_p13 = pnand %p1700_p3, %p1694_p0 }
  0x69   : > { %1704 = shalt.err (!%p1701_p13)
}
  0x6a   : > { %1498 = dma.hbm_to_vmem [thread:$0]  (!%p1919_p8), %s1978_s9, 128, %s220_s11, %s209_s0  }
  0x6b   : > { %p2388_p4 = scmp.ne.s32.totalorder %s2383_s29, 0 }
  0x6c   : > { %s2002_s1 = sand.u32 (!%p2388_p4), 1, %s1769_s16   ;;  %p2389_p13 = scmp.ne.s32.totalorder (!%p2388_p4), %s2380_s26, 0 }
  0x6d   : > { %228 = sbr.rel (%p2388_p4) target bundleno = 1995 (0x7cb), region = 36  ;;  %s1336_s7 = sshll.u32 (!%p2388_p4), %s2002_s1, 5 }
  0x6e   : > { %s231_s30 = scalar_lea.sflag (!%p2388_p4), [#allocation7], %s2002_s1  ;;  %s2008_s12 = scalar_lea.vmem (!%p2388_p4), [#allocation6], %s1336_s7 }
  0x72   : > { %1748 = dma.done.wait (%p2389_p13), %s231_s30, 512  }
  0x73   : > { %1750 = vsyncadd (%p2389_p13), %s231_s30, 4294966784  ;;  %p2390_p8 = scmp.eq.s32.totalorder %s1852_s19, 0 }
  0x75   : > { %1752 = dma.done.wait (%p2390_p8), [#allocation10], 1024   ;;  %p2391_p2 = pmov %p2390_p8 }
  0x76   : > { %s1339_s0 = sshll.u32 %s2002_s1, 3  ;;  %s248_s29 = scalar_lea.sflag [#allocation13], %s2002_s1 }
  0x77   : > { %1754 = vsyncadd (%p2391_p2), [#allocation10], 4294966272  ;;  %s2020_s14 = scalar_lea.vmem [#allocation12], %s1339_s0 }
  0x78   : > { %1756 = dma.done.wait (%p2389_p13), %s248_s29, 128  }
  0x79   : > { %1758 = vsyncadd (%p2389_p13), %s248_s29, 4294967168  ;;  %v1788_v0 = vmov 0.0   ;;  %vm1789_vm0 = vmmov 0   ;;  %v1790_v1 = vmov 0   ;;  %v2032_v2 = vld [vmem:[#allocation9 + $0x18] sm:$0xff]   ;;  %v2035_v4 = vld [vmem:[#allocation9 + $0x10] sm:$0xff]   ;;  %v283_v54 = vlaneseq }
  0x7a   : > { %1411 = vmatprep.subr.bf16.mxu0 %v1788_v0  ;;  %1423 = vmatprep.subr.bf16.mxu1 %v1788_v0  ;;  %v1579_v3 = vld [vmem:[#allocation11 + $0x18] sm:$0xff]   ;;  %v1581_v5 = vld [vmem:[#allocation11 + $0x10] sm:$0xff]   ;;  %v2040_v6 = vld [vmem:[#allocation9 + $0x8] sm:$0xff]   ;;  %vm355_vm3 = vcmask 523264   ;;  %v1791_v22 = vmov 1   ;;  %s280_s26 = scalar_lea.vmem [#allocation14], %s1336_s7 }
  0x7b   : > { %1419 = vmatprep.mubr.msk.bf16.mxu0 %vm1789_vm0, %v1788_v0  ;;  %1431 = vmatprep.mubr.msk.bf16.mxu1 %vm1789_vm0, %v1788_v0  ;;  %v1583_v7 = vld [vmem:[#allocation11 + $0x8] sm:$0xff]   ;;  %v314_v8 = vld [vmem:[%s2008_s12] sm:$0xff]  ;;  %v1357_v20 = vld [vmem:[%s2008_s12 + $0x10] sm:$0xff]  ;;  %s1211_s9 = sshll.u32 %s280_s26, 4  ;;  %s1382_s11 = sshll.u32 %s1852_s19, 7  ;;  %s2316_s9 = int_to_ptr.vmem [resolvable:$true] %s1211_s9 }
  0x7c   : > { %1565 = vset.pattern.permute.xlu0 %v1790_v1  ;;  %1412 = vmatpush3.bf16.msra.mxu0 %v2032_v2  ;;  %v315_v9 = vld [vmem:[%s2008_s12 + $0x8] sm:$0xff]  ;;  %v316_v10 = vmul.f32 0.5, %v314_v8  ;;  %v1584_v13 = vld [vmem:[#allocation9] sm:$0xff]   ;;  %v1358_v21 = vld [vmem:[%s2008_s12 + $0x18] sm:$0xff]  ;;  %s2321_s8 = scalar_lea.hbm %s2372_s4, %s1382_s11  ;;  %s1199_s19 = scalar_lea.sflag [#allocation8], %s2002_s1 }
  0x7d   : > { %1424 = vmatpush3.bf16.msra.mxu1 %v1579_v3  ;;  %1413 = vmatprep.subr.bf16.mxu0 %v1788_v0  ;;  %v317_v11 = vmul.f32 0.5, %v315_v9  ;;  %v2047_v12 = vld [vmem:[%s2020_s14] sm:$0xff]  ;;  %s1705_s10 = scalar_lea.vmem %s2316_s9, 512  ;;  %p2394_p12 = scmp.ne.s32.totalorder %s2381_s27, 0 }
  0x7e   : > { %1425 = vmatprep.subr.bf16.mxu1 %v1788_v0  ;;  %642 = vperm.xlu0 %1565, %v2047_v12   ;;  %v1585_v14 = vld [vmem:[#allocation11] sm:$0xff]   ;;  %vm320_vm1 = vcmp.ge.f32.partialorder %v316_v10, 0.5  ;;  %p1706_p11 = scmp.ne.s32.totalorder %s2316_s9, %s1705_s10  ;;  %s1802_s5 = smov [#allocation14]  }
  0x7f   : > { %vm321_vm2 = vcmp.ge.f32.partialorder %v317_v11, 0.5  ;;  %v1341_v15 = vsel %vm320_vm1, 1.0, %v1788_v0  ;;  %s1709_s20 = sshll.u32 %s1802_s5, 4  ;;  %s1710_s20 = int_to_ptr.vmem [resolvable:$false] %s1709_s20 }
  0x80   : > { %1414 = vmatpush3.bf16.msra.mxu0 %v2035_v4  ;;  %v1342_v16 = vsel %vm321_vm2, 1.0, %v1788_v0  ;;  %v326_v17 = vsub.f32 1.0, %v1341_v15  ;;  %p1707_p9 = pnand %p1706_p11, %p2394_p12  ;;  %s1711_s25 = scalar_lea.vmem %s1710_s20, 1024 }
  0x81   : > { %1426 = vmatpush3.bf16.msra.mxu1 %v1581_v5  ;;  %1415 = vmatprep.subr.bf16.mxu0 %v1788_v0  ;;  %v327_v18 = vsub.f32 1.0, %v1342_v16  ;;  %v330_v19 = vpack.c.bf16 %v1342_v16, %v1341_v15  ;;  %p1712_p1 = scmp.lt.s32.totalorder %s2316_s9, %s1710_s20  ;;  %p1713_p5 = scmp.lt.s32.totalorder %s1711_s25, %s1705_s10 }
  0x82   : > { %1427 = vmatprep.subr.bf16.mxu1 %v1788_v0  ;;  %1566 = vset.pattern.permute.xlu0 %v1791_v22  ;;  %v328_v23 = vmul.f32 %v326_v17, %v316_v10  ;;  %p1708_p10 = pneg %p1707_p9 }
  0x83   : > { %v329_v24 = vmul.f32 %v327_v18, %v317_v11  ;;  %664 = vperm.xlu0 %1566, %v2047_v12   ;;  %p1714_p0 = por %p1713_p5, %p1712_p1 }
  0x84   : > { %1416 = vmatpush3.bf16.msra.mxu0 %v2040_v6  ;;  %v500_v25 = vsub.f32 %v1357_v20, %v328_v23 }
  0x85   : > { %1428 = vmatpush3.bf16.msra.mxu1 %v1583_v7  ;;  %1417 = vmatprep.subr.bf16.mxu0 %v1788_v0  ;;  %v501_v26 = vsub.f32 %v1358_v21, %v329_v24  ;;  %p1715_p7 = pnand %p1714_p0, %p1708_p10 }
  0x86   : > { %1429 = vmatprep.subr.bf16.mxu1 %v1788_v0  ;;  %v502_v27 = vmul.f32 0.5, %v500_v25 }
  0x87   : > { %v503_v28 = vmul.f32 0.5, %v501_v26 }
  0x88   : > { %1418 = vmatpush3.bf16.msra.mxu0 %v1584_v13  ;;  %v504_v29 = vadd.f32 %v502_v27, %v328_v23 }
  0x89   : > { %1430 = vmatpush3.bf16.msra.mxu1 %v1585_v14  ;;  %1435 = vmatprep.subr.bf16.mxu0 %v1788_v0  ;;  %v505_v30 = vadd.f32 %v503_v28, %v329_v24 }
  0x8a   : > { %1447 = vmatprep.subr.bf16.mxu1 %v1788_v0  ;;  %vm506_vm4 = vcmp.ge.f32.partialorder %v504_v29, 0.5 }
  0x8b   : > { %1420 = vmatmul.mubr.msk.bf16.vlgmr.msra.gmra.mxu0 %vm355_vm3, %v330_v19  ;;  %vm507_vm5 = vcmp.ge.f32.partialorder %v505_v30, 0.5  ;;  %v1359_v31 = vsel %vm506_vm4, 1.0, %v1788_v0 }
  0x8c   : > { %1432 = vmatmul.mubr.msk.bf16.vlgmr.msra.gmra.mxu1 %vm355_vm3, %v330_v19  ;;  %1436 = vmatpush3.bf16.msra.mxu0 %v2032_v2  ;;  %v1360_v32 = vsel %vm507_vm5, 1.0, %v1788_v0 }
  0x8d   : > { %1448 = vmatpush3.bf16.msra.mxu1 %v1579_v3  ;;  %1437 = vmatprep.subr.bf16.mxu0 %v1788_v0  ;;  %v512_v33 = vpack.c.bf16 %v1360_v32, %v1359_v31 }
  0x8e   : > { %1449 = vmatprep.subr.bf16.mxu1 %v1788_v0  ;;  %1443 = vmatprep.mubr.msk.bf16.mxu0 %vm1789_vm0, %v1788_v0 }
  0x8f   : > { %1455 = vmatprep.mubr.msk.bf16.mxu1 %vm1789_vm0, %v1788_v0 }
  0x90   : > { %1438 = vmatpush3.bf16.msra.mxu0 %v2035_v4 }
  0x91   : > { %1450 = vmatpush3.bf16.msra.mxu1 %v1581_v5  ;;  %1439 = vmatprep.subr.bf16.mxu0 %v1788_v0 }
  0x92   : > { %1451 = vmatprep.subr.bf16.mxu1 %v1788_v0 }
  0x94   : > { %1440 = vmatpush3.bf16.msra.mxu0 %v2040_v6 }
  0x95   : > { %1452 = vmatpush3.bf16.msra.mxu1 %v1583_v7  ;;  %1441 = vmatprep.subr.bf16.mxu0 %v1788_v0 }
  0x96   : > { %1453 = vmatprep.subr.bf16.mxu1 %v1788_v0 }
  0x98   : > { %1442 = vmatpush3.bf16.msra.mxu0 %v1584_v13 }
  0x99   : > { %1454 = vmatpush3.bf16.msra.mxu1 %v1585_v14  ;;  %1459 = vmatprep.subr.bf16.mxu0 %v2032_v2 }
  0x9b   : > { %1444 = vmatmul.mubr.msk.bf16.vlgmr.msra.gmra.mxu0 %vm355_vm3, %v512_v33 }
  0x9c   : > { %1456 = vmatmul.mubr.msk.bf16.vlgmr.msra.gmra.mxu1 %vm355_vm3, %v512_v33  ;;  %1460 = vmatpush3.bf16.msra.mxu0 %v2032_v2 }
  0x9d   : > { %1461 = vmatprep.subr.bf16.mxu0 %v2035_v4 }
  0xa0   : > { %1462 = vmatpush3.bf16.msra.mxu0 %v2035_v4  ;;  %v284_v4 = vshrl.u32 %v283_v54, 7 }
  0xa1   : > { %1463 = vmatprep.subr.bf16.mxu0 %v2040_v6 }
  0xa2   : > { %v289_v21 = vand.u32 1, %v284_v4 }
  0xa4   : > { %1464 = vmatpush3.bf16.msra.mxu0 %v2040_v6  ;;  %vm2113_vm13 = vcmp.lt.s32.totalorder %v289_v21, 1 }
  0xa5   : > { %1465 = vmatprep.subr.bf16.mxu0 %v1584_v13 }
  0xa8   : > { %1466 = vmatpush3.bf16.msra.mxu0 %v1584_v13 }
  0xf9   : > { %v2105_v23 = vpop.permute.xlu0 %642 }
 0x14b   : > { %v393_v34 = vpop.f32.mrf.mxu0 }
 0x14c   : > { %v465_v35 = vmul.f32 0.5, %v393_v34  ;;  %v458_v36 = vpop.f32.mrf.mxu1 }
 0x14d   : > { %v479_v37 = vmul.f32 0.5, %v458_v36  ;;  %v1421_v38 = vpop.f32.mrf.mxu0 }
 0x14e   : > { %vm469_vm6 = vcmp.ge.f32.partialorder %v465_v35, 0.5  ;;  %v1433_v39 = vpop.f32.mrf.mxu1 }
 0x14f   : > { %v1353_v40 = vsel %vm469_vm6, 1.0, %v1788_v0  ;;  %vm483_vm7 = vcmp.ge.f32.partialorder %v479_v37, 0.5  ;;  %v396_v41 = vpop.f32.mrf.mxu0 }
 0x150   : > { %493 = vst.msk [vmem:[#allocation2] sm:$0xff] %vm355_vm3, %v1353_v40  ;;  %v1355_v42 = vsel %vm483_vm7, 1.0, %v1788_v0  ;;  %v466_v43 = vmul.f32 0.5, %v396_v41  ;;  %v461_v44 = vpop.f32.mrf.mxu1  ;;  %v475_v50 = vsub.f32 1.0, %v1353_v40  ;;  %v2124_v40 = vpop.permute.xlu0 %664 }
 0x151   : > { %495 = vst.msk [vmem:[#allocation3] sm:$0xff] %vm355_vm3, %v1355_v42  ;;  %v480_v45 = vmul.f32 0.5, %v461_v44  ;;  %v1422_v46 = vpop.f32.mrf.mxu0  ;;  %v489_v51 = vsub.f32 1.0, %v1355_v42 }
 0x152   : > { %vm470_vm8 = vcmp.ge.f32.partialorder %v466_v43, 0.5  ;;  %v1434_v47 = vpop.f32.mrf.mxu1  ;;  %v477_v52 = vmul.f32 %v475_v50, %v465_v35 }
 0x153   : > { %v1354_v48 = vsel %vm470_vm8, 1.0, %v1788_v0  ;;  %vm484_vm9 = vcmp.ge.f32.partialorder %v480_v45, 0.5  ;;  %v491_v56 = vmul.f32 %v489_v51, %v479_v37 }
 0x154   : > { %494 = vst.msk [vmem:[#allocation2 + $0x8] sm:$0xff] %vm355_vm3, %v1354_v48  ;;  %v1356_v49 = vsel %vm484_vm9, 1.0, %v1788_v0  ;;  %v476_v53 = vsub.f32 1.0, %v1354_v48 }
 0x155   : > { %496 = vst.msk [vmem:[#allocation3 + $0x8] sm:$0xff] %vm355_vm3, %v1356_v49  ;;  %v490_v57 = vsub.f32 1.0, %v1356_v49 }
 0x156   : > { %v478_v3 = vmul.f32 %v476_v53, %v466_v43 }
 0x157   : > { %v2097_v5 = vld [vmem:[#allocation2] sm:$0xff]  ;;  %v492_v10 = vmul.f32 %v490_v57, %v480_v45 }
 0x158   : > { %v2099_v6 = vld [vmem:[#allocation3] sm:$0xff] }
 0x159   : > { %v636_v18 = vsub.f32 %v2097_v5, %v2099_v6  ;;  %v727_v34 = vadd.f32 %v2099_v6, %v2097_v5 }
 0x15b   : > { %v550_v55 = vpop.f32.mrf.mxu0  ;;  %v2093_v58 = vld [vmem:[#allocation2 + $0x8] sm:$0xff]  ;;  %v649_v31 = vrot.slane %v636_v18, 1  ;;  %v653_v32 = vrot.slane %v636_v18, 7  ;;  %v735_v43 = vrot.slane %v727_v34, 1  ;;  %v739_v44 = vrot.slane %v727_v34, 7 }
 0x15c   : > { %v598_v59 = vsub.f32 %v550_v55, %v477_v52  ;;  %v591_v60 = vpop.f32.mrf.mxu1  ;;  %v2095_v61 = vld [vmem:[#allocation3 + $0x8] sm:$0xff] }
 0x15d   : > { %v610_v62 = vsub.f32 %v591_v60, %v491_v56  ;;  %v1445_v63 = vpop.f32.mrf.mxu0  ;;  %v637_v7 = vsub.f32 %v2093_v58, %v2095_v61  ;;  %v728_v29 = vadd.f32 %v2095_v61, %v2093_v58  ;;  %v659_v41 = vsel %vm2113_vm13, %v649_v31, %v653_v32 }
 0x15e   : > { %v600_v1 = vmul.f32 0.5, %v598_v59  ;;  %v1457_v2 = vpop.f32.mrf.mxu1  ;;  %v667_v48 = vmul.f32 %v2124_v40, %v659_v41  ;;  %v743_v54 = vsel %vm2113_vm13, %v735_v43, %v739_v44  ;;  %v731_v59 = vmul.f32 %v727_v34, %v2105_v23 }
 0x15f   : > { %v612_v8 = vmul.f32 0.5, %v610_v62  ;;  %v553_v9 = vpop.f32.mrf.mxu0  ;;  %v650_v22 = vrot.slane %v637_v7, 1  ;;  %v654_v26 = vrot.slane %v637_v7, 7  ;;  %v736_v38 = vrot.slane %v728_v29, 1 }
 0x160   : > { %v602_v11 = vadd.f32 %v600_v1, %v477_v52  ;;  %v599_v13 = vsub.f32 %v553_v9, %v478_v3  ;;  %v594_v14 = vpop.f32.mrf.mxu1  ;;  %v740_v39 = vrot.slane %v728_v29, 7  ;;  %v646_v47 = vmul.f32 %v2105_v23, %v637_v7 }
 0x161   : > { %v614_v15 = vadd.f32 %v612_v8, %v491_v56  ;;  %v611_v16 = vsub.f32 %v594_v14, %v492_v10  ;;  %v1446_v17 = vpop.f32.mrf.mxu0  ;;  %v660_v36 = vsel %vm2113_vm13, %v650_v22, %v654_v26  ;;  %v645_v52 = vmul.f32 %v2105_v23, %v636_v18 }
 0x162   : > { %vm604_vm10 = vcmp.ge.f32.partialorder %v602_v11, 0.5  ;;  %v601_v19 = vmul.f32 0.5, %v599_v13  ;;  %v1458_v20 = vpop.f32.mrf.mxu1  ;;  %v668_v42 = vmul.f32 %v2124_v40, %v660_v36  ;;  %v744_v49 = vsel %vm2113_vm13, %v736_v38, %v740_v39 }
 0x163   : > { %v1363_v24 = vsel %vm604_vm10, 1.0, %v1788_v0  ;;  %vm616_vm11 = vcmp.ge.f32.partialorder %v614_v15, 0.5  ;;  %v613_v25 = vmul.f32 0.5, %v611_v16  ;;  %v748_v60 = vmul.f32 %v744_v49, %v2124_v40 }
 0x164   : > { %623 = vst.msk [vmem:[#allocation2 + $0x10] sm:$0xff] %vm355_vm3, %v1363_v24  ;;  %v1365_v27 = vsel %vm616_vm11, 1.0, %v1788_v0  ;;  %v603_v28 = vadd.f32 %v601_v19, %v478_v3  ;;  %v672_v53 = vadd.f32 %v668_v42, %v646_v47  ;;  %v671_v63 = vadd.f32 %v667_v48, %v645_v52 }
 0x165   : > { %626 = vst.msk [vmem:[#allocation3 + $0x10] sm:$0xff] %vm355_vm3, %v1365_v27  ;;  %v615_v30 = vadd.f32 %v613_v25, %v492_v10  ;;  %v732_v1 = vmul.f32 %v728_v29, %v2105_v23  ;;  %v747_v9 = vmul.f32 %v743_v54, %v2124_v40 }
 0x166   : > { %vm605_vm12 = vcmp.ge.f32.partialorder %v603_v28, 0.5  ;;  %v676_v13 = vsel %vm355_vm3, %v672_v53, 0.0  ;;  %v675_v26 = vsel %vm355_vm3, %v671_v63, 0.0 }
 0x167   : > { %v1364_v35 = vsel %vm605_vm12, 1.0, %v1788_v0  ;;  %vm617_vm14 = vcmp.ge.f32.partialorder %v615_v30, 0.5  ;;  %v752_v18 = vadd.f32 %v748_v60, %v732_v1  ;;  %v751_v27 = vadd.f32 %v747_v9, %v731_v59 }
 0x168   : > { %624 = vst.msk [vmem:[#allocation2 + $0x18] sm:$0xff] %vm355_vm3, %v1364_v35  ;;  %v1366_v37 = vsel %vm617_vm14, 1.0, %v1788_v0  ;;  %v677_v32 = vadd.f32 %v676_v13, %v675_v26 }
 0x169   : > { %627 = vst.msk [vmem:[#allocation3 + $0x18] sm:$0xff] %vm355_vm3, %v1366_v37  ;;  %v756_v37 = vsel %vm355_vm3, %v752_v18, 0.0  ;;  %v755_v42 = vsel %vm355_vm3, %v751_v27, 0.0 }
 0x16a   : > { %v757_v47 = vadd.f32 %v756_v37, %v755_v42 }
 0x16b   : > { %v2130_v45 = vld [vmem:[#allocation2 + $0x10] sm:$0xff] }
 0x16c   : > { %v2132_v46 = vld [vmem:[#allocation3 + $0x10] sm:$0xff] }
 0x16d   : > { %v638_v50 = vsub.f32 %v2130_v45, %v2132_v46  ;;  %v729_v51 = vadd.f32 %v2132_v46, %v2130_v45 }
 0x16f   : > { %v2145_v55 = vld [vmem:[#allocation2 + $0x18] sm:$0xff]  ;;  %v651_v56 = vrot.slane %v638_v50, 1  ;;  %v655_v57 = vrot.slane %v638_v50, 7  ;;  %v737_v2 = vrot.slane %v729_v51, 1  ;;  %v741_v3 = vrot.slane %v729_v51, 7 }
 0x170   : > { %v2149_v62 = vld [vmem:[#allocation3 + $0x18] sm:$0xff]  ;;  %v647_v10 = vmul.f32 %v2105_v23, %v638_v50  ;;  %v733_v17 = vmul.f32 %v729_v51, %v2105_v23 }
 0x171   : > { %v639_v4 = vsub.f32 %v2145_v55, %v2149_v62  ;;  %v661_v7 = vsel %vm2113_vm13, %v651_v56, %v655_v57  ;;  %v730_v8 = vadd.f32 %v2149_v62, %v2145_v55  ;;  %v745_v14 = vsel %vm2113_vm13, %v737_v2, %v741_v3 }
 0x172   : > { %v669_v11 = vmul.f32 %v2124_v40, %v661_v7  ;;  %v749_v22 = vmul.f32 %v745_v14, %v2124_v40 }
 0x173   : > { %v652_v15 = vrot.slane %v639_v4, 1  ;;  %v656_v16 = vrot.slane %v639_v4, 7  ;;  %v738_v20 = vrot.slane %v730_v8, 1  ;;  %v742_v21 = vrot.slane %v730_v8, 7 }
 0x174   : > { %v673_v19 = vadd.f32 %v669_v11, %v647_v10  ;;  %v648_v24 = vmul.f32 %v2105_v23, %v639_v4  ;;  %v753_v31 = vadd.f32 %v749_v22, %v733_v17  ;;  %v734_v34 = vmul.f32 %v730_v8, %v2105_v23 }
 0x175   : > { %v662_v25 = vsel %vm2113_vm13, %v652_v15, %v656_v16  ;;  %v746_v30 = vsel %vm2113_vm13, %v738_v20, %v742_v21 }
 0x176   : > { %v670_v28 = vmul.f32 %v2124_v40, %v662_v25  ;;  %v678_v29 = vsel %vm355_vm3, %v673_v19, 0.0  ;;  %v750_v35 = vmul.f32 %v746_v30, %v2124_v40  ;;  %v758_v43 = vsel %vm355_vm3, %v753_v31, 0.0 }
 0x177   : > { %v679_v38 = vadd.f32 %v678_v29, %v677_v32  ;;  %v759_v49 = vadd.f32 %v758_v43, %v757_v47  ;;  %v1792_v30 = vmov 3   ;;  %v1795_v47 = vmov 5  }
 0x178   : > { %v674_v36 = vadd.f32 %v670_v28, %v648_v24  ;;  %v754_v39 = vadd.f32 %v750_v35, %v734_v34  ;;  %1567 = vset.pattern.permute.xlu1 %v1792_v30 }
 0x17a   : > { %v680_v41 = vsel %vm355_vm3, %v674_v36, 0.0  ;;  %v760_v48 = vsel %vm355_vm3, %v754_v39, 0.0 }
 0x17b   : > { %v681_v44 = vadd.f32 %v680_v41, %v679_v38  ;;  %v761_v50 = vadd.f32 %v760_v48, %v759_v49 }
 0x17d   : > { %682 = vadd.xlane.f32.xlu1 %v681_v44  ;;  %v1794_v44 = vmov 4  }
 0x181   : > { %762 = vadd.xlane.f32.xlu1 %v761_v50 }
 0x206   : > { %v683_v51 = vpop.xlane.xlu1 %682 }
 0x207   : > { %v684_v52 = vmul.f32 0.00390625, %v683_v51 }
 0x209   : > { %v685_v54 = vsub.f32 %v671_v63, %v684_v52  ;;  %v686_v56 = vsub.f32 %v672_v53, %v684_v52  ;;  %v687_v57 = vsub.f32 %v673_v19, %v684_v52  ;;  %v688_v59 = vsub.f32 %v674_v36, %v684_v52 }
 0x20a   : > { %v763_v60 = vpop.xlane.xlu1 %762 }
 0x20b   : > { %v764_v1 = vmul.f32 0.00390625, %v763_v60  ;;  %v689_v2 = vmul.f32 %v685_v54, %v685_v54  ;;  %v690_v3 = vmul.f32 %v686_v56, %v686_v56  ;;  %v691_v4 = vmul.f32 %v687_v57, %v687_v57 }
 0x20c   : > { %v692_v7 = vmul.f32 %v688_v59, %v688_v59 }
 0x20d   : > { %v2181_v8 = vsub.f32 %v751_v27, %v764_v1  ;;  %v2183_v9 = vsub.f32 %v752_v18, %v764_v1  ;;  %v693_v10 = vsel %vm355_vm3, %v689_v2, 0.0  ;;  %v694_v11 = vsel %vm355_vm3, %v690_v3, 0.0 }
 0x20e   : > { %v695_v13 = vadd.f32 %v694_v11, %v693_v10  ;;  %v767_v14 = vsub.f32 %v753_v31, %v764_v1  ;;  %v696_v53 = vsel %vm355_vm3, %v691_v4, 0.0  ;;  %v768_v63 = vsub.f32 %v754_v39, %v764_v1 }
 0x20f   : > { %v769_v15 = vmul.f32 %v2181_v8, %v2181_v8  ;;  %v770_v16 = vmul.f32 %v2183_v9, %v2183_v9  ;;  %v698_v18 = vsel %vm355_vm3, %v692_v7, 0.0  ;;  %v1793_v31 = vmov 2  }
 0x210   : > { %v697_v17 = vadd.f32 %v696_v53, %v695_v13  ;;  %v771_v19 = vmul.f32 %v767_v14, %v767_v14  ;;  %v772_v20 = vmul.f32 %v768_v63, %v768_v63 }
 0x211   : > { %v773_v21 = vsel %vm355_vm3, %v769_v15, 0.0  ;;  %v774_v22 = vsel %vm355_vm3, %v770_v16, 0.0 }
 0x212   : > { %v699_v24 = vadd.f32 %v698_v18, %v697_v17  ;;  %v775_v25 = vadd.f32 %v774_v22, %v773_v21  ;;  %v776_v26 = vsel %vm355_vm3, %v771_v19, 0.0  ;;  %v778_v28 = vsel %vm355_vm3, %v772_v20, 0.0 }
 0x214   : > { %700 = vadd.xlane.f32.xlu1 %v699_v24  ;;  %v777_v27 = vadd.f32 %v776_v26, %v775_v25 }
 0x216   : > { %v779_v29 = vadd.f32 %v778_v28, %v777_v27 }
 0x218   : > { %780 = vadd.xlane.f32.xlu0 %v779_v29 }
 0x225   : > { %716 = vperm.xlu1 %1567, %v2047_v12  }
 0x229   : > { %1568 = vset.pattern.permute.xlu1 %v1793_v31 }
 0x29d   : > { %v701_v32 = vpop.xlane.xlu1 %700 }
 0x29e   : > { %v702_v34 = vmul.f32 0.00390625, %v701_v32 }
 0x2a0   : > { %v703_v35 = vadd.f32 1e-05, %v702_v34 }
 0x2a1   : > { %v781_v36 = vpop.xlane.xlu0 %780  ;;  %v717_v48 = vpop.permute.xlu1 %716 }
 0x2a2   : > { %1586 = vrsqrt.f32 %v703_v35  ;;  %v782_v37 = vmul.f32 0.00390625, %v781_v36 }
 0x2a4   : > { %v783_v38 = vadd.f32 1e-05, %v782_v37 }
 0x2a6   : > { %1588 = vrsqrt.f32 %v783_v38 }
 0x2af   : > { %v1587_v39 = vpop.eup %1586 }
 0x2b0   : > { %v705_v41 = vmul.f32 %v1587_v39, %v2047_v12 }
 0x2b2   : > { %708 = vperm.xlu1 %1568, %v705_v41  }
 0x2b3   : > { %v1589_v42 = vpop.eup %1588 }
 0x2b4   : > { %v785_v43 = vmul.f32 %v1589_v42, %v2047_v12 }
 0x2b6   : > { %1569 = vset.pattern.permute.xlu1 %v1794_v44 }
 0x2b7   : > { %788 = vperm.xlu1 %1569, %v785_v43  }
 0x2bb   : > { %1570 = vset.pattern.permute.xlu1 %v1795_v47 }
 0x2bc   : > { %796 = vperm.xlu1 %1570, %v2047_v12  }
 0x32d   : > { %v709_v49 = vpop.permute.xlu1 %708 }
 0x32e   : > { %v711_v50 = vmul.f32 %v709_v49, %v685_v54  ;;  %v712_v51 = vmul.f32 %v709_v49, %v686_v56  ;;  %v713_v52 = vmul.f32 %v709_v49, %v687_v57  ;;  %v714_v60 = vmul.f32 %v709_v49, %v688_v59 }
 0x330   : > { %v719_v1 = vadd.f32 %v717_v48, %v711_v50  ;;  %v720_v2 = vadd.f32 %v717_v48, %v712_v51  ;;  %v721_v3 = vadd.f32 %v717_v48, %v713_v52  ;;  %v722_v4 = vadd.f32 %v717_v48, %v714_v60 }
 0x332   : > { %723 = vst.msk [vmem:[#allocation4] sm:$0xff] %vm355_vm3, %v719_v1  ;;  %724 = vst.msk [vmem:[#allocation4 + $0x8] sm:$0xff] %vm355_vm3, %v720_v2  ;;  %v789_v7 = vpop.permute.xlu1 %788 }
 0x333   : > { %725 = vst.msk [vmem:[#allocation4 + $0x10] sm:$0xff] %vm355_vm3, %v721_v3  ;;  %726 = vst.msk [vmem:[#allocation4 + $0x18] sm:$0xff] %vm355_vm3, %v722_v4  ;;  %v791_v10 = vmul.f32 %v789_v7, %v2181_v8  ;;  %v792_v54 = vmul.f32 %v789_v7, %v2183_v9  ;;  %v793_v56 = vmul.f32 %v789_v7, %v767_v14 }
 0x334   : > { %v794_v57 = vmul.f32 %v789_v7, %v768_v63 }
 0x337   : > { %v797_v59 = vpop.permute.xlu1 %796 }
 0x338   : > { %v799_v11 = vadd.f32 %v797_v59, %v791_v10  ;;  %v800_v13 = vadd.f32 %v797_v59, %v792_v54  ;;  %v801_v53 = vadd.f32 %v797_v59, %v793_v56  ;;  %v802_v15 = vadd.f32 %v797_v59, %v794_v57 }
 0x339   : > { %v807_v16 = vld [vmem:[#allocation4] sm:$0xff]  ;;  %v808_v17 = vld [vmem:[#allocation4 + $0x8] sm:$0xff] }
 0x33a   : > { %v809_v19 = vmul.f32 0.5, %v807_v16  ;;  %v810_v18 = vmul.f32 0.5, %v808_v17  ;;  %803 = vst.msk [vmem:[#allocation5] sm:$0xff] %vm355_vm3, %v799_v11  ;;  %804 = vst.msk [vmem:[#allocation5 + $0x8] sm:$0xff] %vm355_vm3, %v800_v13  ;;  %v848_v22 = vld [vmem:[#allocation4 + $0x10] sm:$0xff]  ;;  %v849_v24 = vld [vmem:[#allocation4 + $0x18] sm:$0xff] }
 0x33b   : > { %805 = vst.msk [vmem:[#allocation5 + $0x10] sm:$0xff] %vm355_vm3, %v801_v53  ;;  %806 = vst.msk [vmem:[#allocation5 + $0x18] sm:$0xff] %vm355_vm3, %v802_v15 }
 0x33c   : > { %vm813_vm15 = vcmp.ge.f32.partialorder %v809_v19, 0.5  ;;  %vm814_vm0 = vcmp.ge.f32.partialorder %v810_v18, 0.5 }
 0x33d   : > { %v1367_v8 = vsel %vm813_vm15, 1.0, %v1788_v0  ;;  %v1368_v9 = vsel %vm814_vm0, 1.0, %v1788_v0 }
 0x33e   : > { %v819_v14 = vsub.f32 1.0, %v1367_v8  ;;  %v820_v63 = vsub.f32 1.0, %v1368_v9 }
 0x340   : > { %v821_v20 = vmul.f32 %v819_v14, %v809_v19  ;;  %v822_v21 = vmul.f32 %v820_v63, %v810_v18 }
 0x341   : > { %v823_v25 = vld [vmem:[#allocation5] sm:$0xff]  ;;  %v824_v26 = vld [vmem:[#allocation5 + $0x8] sm:$0xff] }
 0x342   : > { %v850_v27 = vsub.f32 %v848_v22, %v821_v20  ;;  %v851_v28 = vsub.f32 %v849_v24, %v822_v21  ;;  %v825_v29 = vmul.f32 0.5, %v823_v25  ;;  %v826_v30 = vmul.f32 0.5, %v824_v26  ;;  %v863_v47 = vld [vmem:[#allocation5 + $0x10] sm:$0xff]  ;;  %v864_v48 = vld [vmem:[#allocation5 + $0x18] sm:$0xff] }
 0x344   : > { %vm829_vm1 = vcmp.ge.f32.partialorder %v825_v29, 0.5  ;;  %vm830_vm2 = vcmp.ge.f32.partialorder %v826_v30, 0.5  ;;  %v852_v34 = vmul.f32 0.5, %v850_v27  ;;  %v853_v35 = vmul.f32 0.5, %v851_v28 }
 0x345   : > { %v1369_v31 = vsel %vm829_vm1, 1.0, %v1788_v0  ;;  %v1370_v32 = vsel %vm830_vm2, 1.0, %v1788_v0 }
 0x346   : > { %v835_v36 = vsub.f32 1.0, %v1369_v31  ;;  %v836_v37 = vsub.f32 1.0, %v1370_v32  ;;  %v839_v38 = vsub.f32 %v1367_v8, %v1369_v31  ;;  %v840_v39 = vsub.f32 %v1368_v9, %v1370_v32 }
 0x347   : > { %v843_v41 = vadd.f32 %v1369_v31, %v1367_v8  ;;  %v844_v42 = vadd.f32 %v1370_v32, %v1368_v9  ;;  %v854_v49 = vadd.f32 %v852_v34, %v821_v20  ;;  %v855_v50 = vadd.f32 %v853_v35, %v822_v21 }
 0x348   : > { %v837_v43 = vmul.f32 %v835_v36, %v825_v29  ;;  %v838_v44 = vmul.f32 %v836_v37, %v826_v30  ;;  %841 = vst.msk [vmem:[#allocation4] sm:$0xff] %vm355_vm3, %v839_v38  ;;  %842 = vst.msk [vmem:[#allocation4 + $0x8] sm:$0xff] %vm355_vm3, %v840_v39 }
 0x349   : > { %845 = vst.msk [vmem:[#allocation5] sm:$0xff] %vm355_vm3, %v843_v41  ;;  %846 = vst.msk [vmem:[#allocation5 + $0x8] sm:$0xff] %vm355_vm3, %v844_v42  ;;  %vm856_vm4 = vcmp.ge.f32.partialorder %v854_v49, 0.5  ;;  %vm857_vm5 = vcmp.ge.f32.partialorder %v855_v50, 0.5 }
 0x34a   : > { %v865_v51 = vsub.f32 %v863_v47, %v837_v43  ;;  %v866_v52 = vsub.f32 %v864_v48, %v838_v44  ;;  %v1371_v10 = vsel %vm856_vm4, 1.0, %v1788_v0  ;;  %v1372_v54 = vsel %vm857_vm5, 1.0, %v1788_v0 }
 0x34c   : > { %v867_v60 = vmul.f32 0.5, %v865_v51  ;;  %v868_v1 = vmul.f32 0.5, %v866_v52 }
 0x34e   : > { %v869_v2 = vadd.f32 %v867_v60, %v837_v43  ;;  %v870_v3 = vadd.f32 %v868_v1, %v838_v44 }
 0x34f   : > { %v885_v59 = vld [vmem:[#allocation4] sm:$0xff]  ;;  %v886_v11 = vld [vmem:[#allocation4 + $0x8] sm:$0xff] }
 0x350   : > { %vm871_vm6 = vcmp.ge.f32.partialorder %v869_v2, 0.5  ;;  %vm872_vm7 = vcmp.ge.f32.partialorder %v870_v3, 0.5  ;;  %v961_v4 = vld [vmem:[#allocation5] sm:$0xff]  ;;  %v962_v7 = vld [vmem:[#allocation5 + $0x8] sm:$0xff]  ;;  %v893_v9 = vrot.slane %v885_v59, 1  ;;  %v897_v20 = vrot.slane %v885_v59, 7 }
 0x351   : > { %v1373_v56 = vsel %vm871_vm6, 1.0, %v1788_v0  ;;  %v1374_v57 = vsel %vm872_vm7, 1.0, %v1788_v0  ;;  %v969_v17 = vrot.slane %v961_v4, 1  ;;  %v970_v19 = vrot.slane %v962_v7, 1 }
 0x352   : > { %v877_v13 = vsub.f32 %v1371_v10, %v1373_v56  ;;  %v878_v53 = vsub.f32 %v1372_v54, %v1374_v57  ;;  %v881_v15 = vadd.f32 %v1373_v56, %v1371_v10  ;;  %v882_v16 = vadd.f32 %v1374_v57, %v1372_v54 }
 0x353   : > { %v973_v18 = vrot.slane %v961_v4, 7  ;;  %v974_v8 = vrot.slane %v962_v7, 7  ;;  %v894_v0 = vrot.slane %v886_v11, 1  ;;  %v898_v21 = vrot.slane %v886_v11, 7 }
 0x354   : > { %879 = vst.msk [vmem:[#allocation4 + $0x10] sm:$0xff] %vm355_vm3, %v877_v13  ;;  %883 = vst.msk [vmem:[#allocation5 + $0x10] sm:$0xff] %vm355_vm3, %v881_v15  ;;  %v965_v22 = vmul.f32 %v961_v4, %v2105_v23  ;;  %v966_v24 = vmul.f32 %v962_v7, %v2105_v23  ;;  %v901_v27 = vsel %vm2113_vm13, %v893_v9, %v897_v20 }
 0x355   : > { %884 = vst.msk [vmem:[#allocation5 + $0x18] sm:$0xff] %vm355_vm3, %v882_v16  ;;  %880 = vst.msk [vmem:[#allocation4 + $0x18] sm:$0xff] %vm355_vm3, %v878_v53  ;;  %v977_v14 = vsel %vm2113_vm13, %v969_v17, %v973_v18  ;;  %v978_v63 = vsel %vm2113_vm13, %v970_v19, %v974_v8  ;;  %v902_v28 = vsel %vm2113_vm13, %v894_v0, %v898_v21 }
 0x356   : > { %v981_v25 = vmul.f32 %v977_v14, %v2124_v40  ;;  %v982_v26 = vmul.f32 %v978_v63, %v2124_v40  ;;  %v905_v31 = vmul.f32 %v901_v27, %v2124_v40  ;;  %v906_v32 = vmul.f32 %v902_v28, %v2124_v40 }
 0x357   : > { %v889_v34 = vmul.f32 %v885_v59, %v2105_v23  ;;  %v890_v35 = vmul.f32 %v886_v11, %v2105_v23 }
 0x358   : > { %v985_v29 = vadd.f32 %v981_v25, %v965_v22  ;;  %v986_v30 = vadd.f32 %v982_v26, %v966_v24 }
 0x359   : > { %v909_v47 = vadd.f32 %v905_v31, %v889_v34  ;;  %v910_v48 = vadd.f32 %v906_v32, %v890_v35 }
 0x35a   : > { %v989_v38 = vsel %vm355_vm3, %v985_v29, 0.0  ;;  %v990_v39 = vsel %vm355_vm3, %v986_v30, 0.0 }
 0x35b   : > { %v963_v36 = vld [vmem:[#allocation5 + $0x10] sm:$0xff]  ;;  %v913_v15 = vsel %vm355_vm3, %v909_v47, 0.0  ;;  %v914_v16 = vsel %vm355_vm3, %v910_v48, 0.0  ;;  %v991_v19 = vadd.f32 %v990_v39, %v989_v38 }
 0x35c   : > { %v964_v37 = vld [vmem:[#allocation5 + $0x18] sm:$0xff]  ;;  %v887_v41 = vld [vmem:[#allocation4 + $0x10] sm:$0xff]  ;;  %v971_v42 = vrot.slane %v963_v36, 1  ;;  %v967_v49 = vmul.f32 %v963_v36, %v2105_v23  ;;  %v975_v51 = vrot.slane %v963_v36, 7  ;;  %v915_v0 = vadd.f32 %v914_v16, %v913_v15 }
 0x35d   : > { %v972_v43 = vrot.slane %v964_v37, 1  ;;  %v888_v44 = vld [vmem:[#allocation4 + $0x18] sm:$0xff]  ;;  %v968_v50 = vmul.f32 %v964_v37, %v2105_v23  ;;  %v976_v52 = vrot.slane %v964_v37, 7  ;;  %v895_v60 = vrot.slane %v887_v41, 1 }
 0x35e   : > { %v896_v1 = vrot.slane %v888_v44, 1  ;;  %v899_v2 = vrot.slane %v887_v41, 7  ;;  %v900_v3 = vrot.slane %v888_v44, 7  ;;  %v979_v4 = vsel %vm2113_vm13, %v971_v42, %v975_v51 }
 0x35f   : > { %v980_v7 = vsel %vm2113_vm13, %v972_v43, %v976_v52  ;;  %v891_v10 = vmul.f32 %v887_v41, %v2105_v23  ;;  %v892_v54 = vmul.f32 %v888_v44, %v2105_v23  ;;  %v983_v56 = vmul.f32 %v979_v4, %v2124_v40 }
 0x360   : > { %v984_v57 = vmul.f32 %v980_v7, %v2124_v40  ;;  %v903_v59 = vsel %vm2113_vm13, %v895_v60, %v899_v2  ;;  %v904_v11 = vsel %vm2113_vm13, %v896_v1, %v900_v3 }
 0x361   : > { %v907_v13 = vmul.f32 %v903_v59, %v2124_v40  ;;  %v908_v53 = vmul.f32 %v904_v11, %v2124_v40  ;;  %v987_v17 = vadd.f32 %v983_v56, %v967_v49  ;;  %v1797_v59 = vmov 6  }
 0x362   : > { %v988_v23 = vadd.f32 %v984_v57, %v968_v50  ;;  %v1796_v57 = vmov 7   ;;  %1571 = vset.pattern.permute.xlu0 %v1797_v59  ;;  %v1798_v11 = vmov 8  }
 0x363   : > { %v911_v18 = vadd.f32 %v907_v13, %v891_v10  ;;  %v912_v8 = vadd.f32 %v908_v53, %v892_v54  ;;  %v992_v9 = vsel %vm355_vm3, %v987_v17, 0.0  ;;  %1572 = vset.pattern.permute.xlu1 %v1796_v57 }
 0x364   : > { %v993_v14 = vadd.f32 %v992_v9, %v991_v19  ;;  %v994_v63 = vsel %vm355_vm3, %v988_v23, 0.0 }
 0x365   : > { %v916_v33 = vsel %vm355_vm3, %v911_v18, 0.0  ;;  %v918_v40 = vsel %vm355_vm3, %v912_v8, 0.0 }
 0x366   : > { %v917_v20 = vadd.f32 %v916_v33, %v915_v0  ;;  %v995_v21 = vadd.f32 %v994_v63, %v993_v14  ;;  %v1799_v0 = vmov 9  }
 0x368   : > { %v919_v22 = vadd.f32 %v918_v40, %v917_v20  ;;  %996 = vadd.xlane.f32.xlu0 %v995_v21 }
 0x36a   : > { %920 = vadd.xlane.f32.xlu1 %v919_v22 }
 0x37b   : > { %954 = vperm.xlu1 %1572, %v2047_v12  }
 0x37f   : > { %1573 = vset.pattern.permute.xlu1 %v1798_v11 }
 0x3f1   : > { %v997_v24 = vpop.xlane.xlu0 %996 }
 0x3f2   : > { %v998_v25 = vmul.f32 0.00390625, %v997_v24 }
 0x3f3   : > { %v921_v26 = vpop.xlane.xlu1 %920 }
 0x3f4   : > { %v922_v27 = vmul.f32 0.00390625, %v921_v26  ;;  %v2267_v28 = vsub.f32 %v985_v29, %v998_v25  ;;  %v2269_v31 = vsub.f32 %v986_v30, %v998_v25  ;;  %v2271_v32 = vsub.f32 %v987_v17, %v998_v25 }
 0x3f5   : > { %v1002_v44 = vsub.f32 %v988_v23, %v998_v25 }
 0x3f6   : > { %v923_v34 = vsub.f32 %v909_v47, %v922_v27  ;;  %v924_v35 = vsub.f32 %v910_v48, %v922_v27  ;;  %v925_v36 = vsub.f32 %v911_v18, %v922_v27  ;;  %v926_v37 = vsub.f32 %v912_v8, %v922_v27 }
 0x3f7   : > { %v1003_v38 = vmul.f32 %v2267_v28, %v2267_v28  ;;  %v1004_v39 = vmul.f32 %v2269_v31, %v2269_v31  ;;  %v1005_v50 = vmul.f32 %v2271_v32, %v2271_v32  ;;  %v1006_v3 = vmul.f32 %v1002_v44, %v1002_v44  ;;  %v955_v14 = vpop.permute.xlu1 %954 }
 0x3f8   : > { %v927_v41 = vmul.f32 %v923_v34, %v923_v34  ;;  %v928_v42 = vmul.f32 %v924_v35, %v924_v35  ;;  %v929_v43 = vmul.f32 %v925_v36, %v925_v36  ;;  %v930_v49 = vmul.f32 %v926_v37, %v926_v37 }
 0x3f9   : > { %v1007_v29 = vsel %vm355_vm3, %v1003_v38, 0.0  ;;  %v1008_v30 = vsel %vm355_vm3, %v1004_v39, 0.0  ;;  %v1010_v4 = vsel %vm355_vm3, %v1005_v50, 0.0  ;;  %v1012_v54 = vsel %vm355_vm3, %v1006_v3, 0.0 }
 0x3fa   : > { %v931_v47 = vsel %vm355_vm3, %v927_v41, 0.0  ;;  %v932_v48 = vsel %vm355_vm3, %v928_v42, 0.0  ;;  %v1009_v52 = vadd.f32 %v1008_v30, %v1007_v29  ;;  %v934_v60 = vsel %vm355_vm3, %v929_v43, 0.0 }
 0x3fb   : > { %v933_v51 = vadd.f32 %v932_v48, %v931_v47  ;;  %v936_v2 = vsel %vm355_vm3, %v930_v49, 0.0 }
 0x3fc   : > { %v1011_v10 = vadd.f32 %v1010_v4, %v1009_v52 }
 0x3fd   : > { %v935_v1 = vadd.f32 %v934_v60, %v933_v51 }
 0x3fe   : > { %v1013_v56 = vadd.f32 %v1012_v54, %v1011_v10 }
 0x3ff   : > { %v937_v7 = vadd.f32 %v936_v2, %v935_v1 }
 0x401   : > { %938 = vadd.xlane.f32.xlu0 %v937_v7 }
 0x405   : > { %1014 = vadd.xlane.f32.xlu0 %v1013_v56 }
 0x48a   : > { %v939_v13 = vpop.xlane.xlu0 %938 }
 0x48b   : > { %v940_v53 = vmul.f32 0.00390625, %v939_v13 }
 0x48d   : > { %v941_v15 = vadd.f32 1e-05, %v940_v53 }
 0x48e   : > { %v1015_v16 = vpop.xlane.xlu0 %1014 }
 0x48f   : > { %1590 = vrsqrt.f32 %v941_v15  ;;  %v1016_v17 = vmul.f32 0.00390625, %v1015_v16 }
 0x491   : > { %v1017_v23 = vadd.f32 1e-05, %v1016_v17 }
 0x493   : > { %1592 = vrsqrt.f32 %v1017_v23 }
 0x49c   : > { %v1591_v19 = vpop.eup %1590 }
 0x49d   : > { %v943_v18 = vmul.f32 %v1591_v19, %v2047_v12 }
 0x49f   : > { %946 = vperm.xlu0 %1571, %v943_v18  }
 0x4a0   : > { %v1593_v8 = vpop.eup %1592 }
 0x4a1   : > { %v1019_v9 = vmul.f32 %v1593_v8, %v2047_v12 }
 0x4a3   : > { %1022 = vperm.xlu1 %1573, %v1019_v9  }
 0x4a7   : > { %1574 = vset.pattern.permute.xlu1 %v1799_v0 }
 0x4a8   : > { %1030 = vperm.xlu1 %1574, %v2047_v12  }
 0x51a   : > { %v947_v33 = vpop.permute.xlu0 %946 }
 0x51b   : > { %v949_v20 = vmul.f32 %v947_v33, %v923_v34  ;;  %v950_v21 = vmul.f32 %v947_v33, %v924_v35  ;;  %v951_v40 = vmul.f32 %v947_v33, %v925_v36  ;;  %v952_v22 = vmul.f32 %v947_v33, %v926_v37 }
 0x51d   : > { %v957_v38 = vadd.f32 %v955_v14, %v949_v20  ;;  %v958_v39 = vadd.f32 %v955_v14, %v950_v21  ;;  %v959_v41 = vadd.f32 %v955_v14, %v951_v40  ;;  %v960_v42 = vadd.f32 %v955_v14, %v952_v22 }
 0x51e   : > { %v1023_v63 = vpop.permute.xlu1 %1022 }
 0x51f   : > { %v1025_v24 = vmul.f32 %v1023_v63, %v2267_v28  ;;  %v1026_v25 = vmul.f32 %v1023_v63, %v2269_v31  ;;  %v1027_v26 = vmul.f32 %v1023_v63, %v2271_v32  ;;  %v1028_v27 = vmul.f32 %v1023_v63, %v1002_v44 }
 0x523   : > { %v1031_v43 = vpop.permute.xlu1 %1030 }
 0x524   : > { %v1033_v12 = vadd.f32 %v1031_v43, %v1025_v24  ;;  %v1034_v29 = vadd.f32 %v1031_v43, %v1026_v25  ;;  %v1035_v30 = vadd.f32 %v1031_v43, %v1027_v26  ;;  %v1036_v49 = vadd.f32 %v1031_v43, %v1028_v27 }
 0x526   : > { %v1041_v34 = vsub.f32 %v957_v38, %v1033_v12  ;;  %v1042_v35 = vsub.f32 %v958_v39, %v1034_v29  ;;  %v1043_v36 = vsub.f32 %v959_v41, %v1035_v30  ;;  %v1044_v37 = vsub.f32 %v960_v42, %v1036_v49 }
 0x527   : > { %v1053_v47 = vadd.f32 %v1033_v12, %v957_v38  ;;  %v1054_v28 = vadd.f32 %v1034_v29, %v958_v39  ;;  %v1055_v48 = vadd.f32 %v1035_v30, %v959_v41  ;;  %v1056_v31 = vadd.f32 %v1036_v49, %v960_v42 }
 0x528   : > { %v1045_v32 = vmul.f32 %v1041_v34, %v2097_v5  ;;  %v1046_v44 = vmul.f32 %v1042_v35, %v2093_v58  ;;  %v1047_v50 = vmul.f32 %v1043_v36, %v2130_v45  ;;  %v1048_v51 = vmul.f32 %v1044_v37, %v2145_v55 }
 0x529   : > { %v1057_v52 = vmul.f32 %v1053_v47, %v2099_v6  ;;  %v1058_v60 = vmul.f32 %v1054_v28, %v2095_v61  ;;  %v1059_v1 = vmul.f32 %v1055_v48, %v2132_v46  ;;  %v1060_v2 = vmul.f32 %v1056_v31, %v2149_v62  ;;  %v1596_v47 = vld [vmem:[%s2020_s14] sm:$0xff] }
 0x52a   : > { %v1800_v36 = vmov 10   ;;  %v1801_v37 = vmov 11  }
 0x52b   : > { %v1061_v3 = vsub.f32 %v1045_v32, %v1057_v52  ;;  %v1062_v4 = vsub.f32 %v1046_v44, %v1058_v60  ;;  %v1063_v7 = vsub.f32 %v1047_v50, %v1059_v1  ;;  %v1064_v10 = vsub.f32 %v1048_v51, %v1060_v2  ;;  %1575 = vset.pattern.permute.xlu0 %v1800_v36 }
 0x52c   : > { %1576 = vset.pattern.permute.xlu1 %v1801_v37 }
 0x52d   : > { %v1375_v54 = vadd.f32 -0.06, %v1061_v3  ;;  %v1376_v5 = vadd.f32 -0.06, %v1062_v4  ;;  %vm1073_vm8 = vcmp.lt.f32.partialorder %v1061_v3, -0.06 }
 0x52e   : > { %vm1074_vm9 = vcmp.lt.f32.partialorder %v1062_v4, -0.06  ;;  %vm1065_vm10 = vcmp.gt.f32.partialorder %v1061_v3, 0.06  ;;  %v1077_v58 = vadd.f32 0.06, %v1061_v3 }
 0x52f   : > { %v1078_v45 = vadd.f32 0.06, %v1062_v4  ;;  %vm1066_vm11 = vcmp.gt.f32.partialorder %v1062_v4, 0.06  ;;  %v1377_v55 = vadd.f32 -0.06, %v1063_v7 }
 0x530   : > { %v1378_v6 = vadd.f32 -0.06, %v1064_v10  ;;  %v1081_v56 = vsel %vm1073_vm8, %v1077_v58, 0.0  ;;  %vm1075_vm12 = vcmp.lt.f32.partialorder %v1063_v7, -0.06 }
 0x531   : > { %v1082_v61 = vsel %vm1074_vm9, %v1078_v45, 0.0  ;;  %vm1076_vm13 = vcmp.lt.f32.partialorder %v1064_v10, -0.06  ;;  %v1085_v46 = vsel %vm1065_vm10, %v1375_v54, %v1081_v56  ;;  %v1079_v57 = vadd.f32 0.06, %v1063_v7 }
 0x532   : > { %v1086_v62 = vsel %vm1066_vm11, %v1376_v5, %v1082_v61  ;;  %v1080_v59 = vadd.f32 0.06, %v1064_v10  ;;  %vm1067_vm14 = vcmp.gt.f32.partialorder %v1063_v7, 0.06  ;;  %vm1068_vm15 = vcmp.gt.f32.partialorder %v1064_v10, 0.06 }
 0x533   : > { %v1089_v11 = vpack.c.bf16 %v1086_v62, %v1085_v46  ;;  %v1083_v13 = vsel %vm1075_vm12, %v1079_v57, 0.0 }
 0x534   : > { %v1084_v53 = vsel %vm1076_vm13, %v1080_v59, 0.0  ;;  %v1087_v15 = vsel %vm1067_vm14, %v1377_v55, %v1083_v13 }
 0x535   : > { %1467 = vmatprep.mubr.msk.bf16.mxu0 %vm355_vm3, %v1089_v11  ;;  %v1088_v16 = vsel %vm1068_vm15, %v1378_v6, %v1084_v53 }
 0x536   : > { %v1090_v17 = vpack.c.bf16 %v1088_v16, %v1087_v15 }
 0x538   : > { %1468 = vmatmul.mubr.msk.bf16.vlgmr.msra.gmra.mxu0 %vm355_vm3, %v1090_v17 }
 0x5f8   : > { %v1469_v23 = vpop.f32.mrf.mxu0 }
 0x5f9   : > { %v1149_v33 = vsel %vm355_vm3, %v1469_v23, 0.0 }
 0x5fa   : > { %v1131_v19 = vpop.f32.mrf.mxu0 }
 0x5fb   : > { %v1146_v9 = vsel %vm355_vm3, %v1131_v19, 0.0 }
 0x5fc   : > { %v1470_v18 = vpop.f32.mrf.mxu0 }
 0x5fd   : > { %v1151_v20 = vsel %vm355_vm3, %v1470_v18, 0.0 }
 0x5fe   : > { %v1134_v8 = vpop.f32.mrf.mxu0 }
 0x5ff   : > { %v1147_v0 = vsel %vm355_vm3, %v1134_v8, 0.0 }
 0x600   : > { %v1148_v14 = vadd.f32 %v1147_v0, %v1146_v9 }
 0x602   : > { %v1150_v63 = vadd.f32 %v1149_v33, %v1148_v14 }
 0x604   : > { %v1152_v21 = vadd.f32 %v1151_v20, %v1150_v63 }
 0x606   : > { %1153 = vadd.xlane.f32.xlu0 %v1152_v21 }
 0x68f   : > { %v1154_v40 = vpop.xlane.xlu0 %1153 }
 0x690   : > { %v1155_v22 = vmul.f32 0.00390625, %v1154_v40 }
 0x692   : > { %v1156_v24 = vsub.f32 %v1131_v19, %v1155_v22  ;;  %v1157_v25 = vsub.f32 %v1134_v8, %v1155_v22  ;;  %v1158_v26 = vsub.f32 %v1469_v23, %v1155_v22  ;;  %v1159_v27 = vsub.f32 %v1470_v18, %v1155_v22 }
 0x694   : > { %v1160_v38 = vmul.f32 %v1156_v24, %v1156_v24  ;;  %v1161_v39 = vmul.f32 %v1157_v25, %v1157_v25  ;;  %v1162_v41 = vmul.f32 %v1158_v26, %v1158_v26  ;;  %v1163_v42 = vmul.f32 %v1159_v27, %v1159_v27 }
 0x696   : > { %v1164_v43 = vsel %vm355_vm3, %v1160_v38, 0.0  ;;  %v1165_v12 = vsel %vm355_vm3, %v1161_v39, 0.0  ;;  %v1167_v30 = vsel %vm355_vm3, %v1162_v41, 0.0  ;;  %v1169_v34 = vsel %vm355_vm3, %v1163_v42, 0.0 }
 0x697   : > { %v1166_v29 = vadd.f32 %v1165_v12, %v1164_v43 }
 0x699   : > { %v1168_v49 = vadd.f32 %v1167_v30, %v1166_v29 }
 0x69b   : > { %v1170_v35 = vadd.f32 %v1169_v34, %v1168_v49 }
 0x69d   : > { %1171 = vadd.xlane.f32.xlu1 %v1170_v35 }
 0x6ae   : > { %1187 = vperm.xlu1 %1576, %v1596_v47  }
 0x726   : > { %v1172_v28 = vpop.xlane.xlu1 %1171 }
 0x727   : > { %v1173_v48 = vmul.f32 0.00390625, %v1172_v28 }
 0x729   : > { %v1174_v31 = vadd.f32 1e-05, %v1173_v48 }
 0x72a   : > { %v1188_v51 = vpop.permute.xlu1 %1187 }
 0x72b   : > { %1594 = vrsqrt.f32 %v1174_v31 }
 0x738   : > { %v1595_v32 = vpop.eup %1594 }
 0x739   : > { %v1176_v44 = vmul.f32 %v1596_v47, %v1595_v32 }
 0x73b   : > { %1179 = vperm.xlu0 %1575, %v1176_v44  }
 0x73f   : > { %1577 = vset.pattern.permute.xlu0 %v1801_v37 }
 0x7b6   : > { %v1180_v50 = vpop.permute.xlu0 %1179 }
 0x7b7   : > { %v1182_v52 = vmul.f32 %v1180_v50, %v1156_v24  ;;  %v1183_v60 = vmul.f32 %v1180_v50, %v1157_v25  ;;  %v1184_v1 = vmul.f32 %v1180_v50, %v1158_v26  ;;  %v1185_v2 = vmul.f32 %v1180_v50, %v1159_v27 }
 0x7b9   : > { %v1190_v3 = vadd.f32 %v1188_v51, %v1182_v52  ;;  %v1191_v4 = vadd.f32 %v1188_v51, %v1183_v60  ;;  %v1192_v7 = vadd.f32 %v1188_v51, %v1184_v1  ;;  %v1193_v10 = vadd.f32 %v1188_v51, %v1185_v2 }
 0x7bb   : > { %1194 = vst.msk [vmem:[%s280_s26] sm:$0xff] %vm355_vm3, %v1190_v3  ;;  %1195 = vst.msk [vmem:[%s280_s26 + $0x8] sm:$0xff] %vm355_vm3, %v1191_v4 }
 0x7bc   : > { %1196 = vst.msk [vmem:[%s280_s26 + $0x10] sm:$0xff] %vm355_vm3, %v1192_v7  ;;  %1197 = vst.msk [vmem:[%s280_s26 + $0x18] sm:$0xff] %vm355_vm3, %v1193_v10 }
 0x7bd   : > { %1718 = shalt.err (!%p1715_p7)
}
 0x7be   : > { %s1719_s22 = scalar_lea.hbm %s2321_s8, 512  ;;  %s1723_s30 = scalar_lea.hbm %s2372_s4, 1024 }
 0x7bf   : > { %p1720_p6 = scmp.ne.s32.totalorder %s2321_s8, %s1719_s22  ;;  %p1724_p13 = scmp.lt.s32.totalorder %s2321_s8, %s2372_s4 }
 0x7c0   : > { %p1725_p8 = scmp.lt.s32.totalorder %s1723_s30, %s1719_s22 }
 0x7c1   : > { %p1721_p3 = pnand %p1720_p6, %p2394_p12 }
 0x7c2   : > { %p1726_p2 = por %p1725_p8, %p1724_p13 }
 0x7c3   : > { %p1722_p4 = pneg %p1721_p3 }
 0x7c5   : > { %p1727_p11 = pnand %p1726_p2, %p1722_p4 }
 0x7c7   : > { %1730 = shalt.err (!%p1727_p11)
}
 0x7c8   : > { %s1803_s29 = smov 128   ;;  %s1804_s14 = smov 256  }
 0x7c9   : > { %s1805_s26 = smov 8  }
 0x7ca   : > { %1483 = dma.vmem_to_hbm [thread:$0]  (%p2394_p12), %s2316_s9, 512, %s2321_s8, %s1199_s19, %s1803_s29, %s1804_s14, %s1805_s26  }
 0x7cb PF: > { %s1226_s11 = sand.u32 1, %s1765_s15   ;;  %p2395_p9 = scmp.ne.s32.totalorder %s2382_s28, 0 }
 0x7cc   : > { %p2396_p10 = scmp.ge.s32.totalorder %s1777_s18, 2  ;;  %s1227_s6 = scalar_lea.sflag [#allocation8], %s1226_s11 }
 0x7ce   : > { %p1500_p1 = pnand %p2396_p10, %p2395_p9 }
 0x7d0   : > { %p1501_p5 = pneg %p1500_p1 }
 0x7d2   : > { %1760 = dma.done.wait (%p1501_p5), %s1227_s6, 512  }
 0x7d3   : > { %1762 = vsyncadd (%p1501_p5), %s1227_s6, 4294966784  ;;  %p21_p0 = scmp.ge.s32.totalorder %s1856_s21, 4   ;;  %s2397_s15 = smov %s1769_s16 }
 0x7d4   : > { %s2398_s16 = smov %s1773_s17  ;;  %s2399_s17 = smov %s1868_s24 }
 0x7d5   : > { %s2400_s18 = smov %s1856_s21  ;;  %23 = sbr.rel (!%p21_p0) target bundleno = 11 (0xb), region = 107 }
 0x7da   :  { %1232 = vsyncpa [#allocation7], 1 }
 0x7db   :  { %1234 = vsyncpa [#allocation7 + $0x1], 1 }
 0x7dc   :  { %1235 = vsyncpa [#allocation10], 1 }
 0x7dd   :  { %1236 = vsyncpa [#allocation13], 1 }
 0x7de   :  { %1238 = vsyncpa [#allocation13 + $0x1], 1 }
 0x7df   :  { %1239 = vsyncpa [#allocation8], 1 }
 0x7e0   :  { %1241 = vsyncpa [#allocation8 + $0x1], 1 }

</bundles_post_ra>
